<compile_context>
chip_gen: v5e
topology: v5e:2x2
jax: 0.10.0
libtpu: 0.0.40
codegen_flags: <defaults>
</compile_context>

<pallas_src>
import functools
import math

import jax
import jax.numpy as jnp
from jax.experimental import pallas as pl
from jax.experimental.pallas import tpu as pltpu

_BN_EPS = 1e-5
_LANE = 128


# --------------------------------------------------------------------------
# small helpers
# --------------------------------------------------------------------------
def _round_up(v, m):
    return (v + m - 1) // m * m


def _pick_row_block(ho, wo, target_m=256):
    """Output rows per grid step; keeps the M tile (tr*wo) a multiple of 8."""
    tr = max(1, min(ho, max(1, target_m // wo)))
    align = 8 // math.gcd(wo, 8)
    tr = min(_round_up(tr, align), max(align, 64))
    nblk = -(-ho // tr)
    return tr, nblk


def _halo_rows(img, stride, tr, nblk):
    """Zero-pad an NHWC image for a 3x3/pad-1 conv and cut it into per-row-block
    halo windows.  The W axis is phase-split by `stride` so every in-kernel tap
    read is a contiguous slice.  Returns (N*nblk*trin, stride, Wq, C), f32/bf16.
    Duplication is only the 2-row halos (~1.1-1.3x), never a 9x im2col blow-up."""
    n, h, w, c = img.shape
    xp = jnp.pad(img, ((0, 0), (1, 1), (1, 1), (0, 0)))
    hp, wp = h + 2, w + 2
    trin = (tr - 1) * stride + 3
    need_h = (nblk - 1) * tr * stride + trin
    if need_h > hp:
        xp = jnp.pad(xp, ((0, 0), (0, need_h - hp), (0, 0), (0, 0)))
    wq = -(-wp // stride)
    if wq * stride > wp:
        xp = jnp.pad(xp, ((0, 0), (0, 0), (0, wq * stride - wp), (0, 0)))
    xp = xp.reshape(n, xp.shape[1], wq, stride, c).transpose(0, 1, 3, 2, 4)
    wins = jnp.stack(
        [xp[:, b * tr * stride: b * tr * stride + trin] for b in range(nblk)],
        axis=1)                                   # (n, nblk, trin, stride, wq, c)
    return wins.reshape(n * nblk * trin, stride, wq, c)


def _prep_w3x3(w_hwio, cop, pad_in=False):
    kh, kw, ci, co = w_hwio.shape
    w = jnp.pad(w_hwio, ((0, 0), (0, 0),
                         (0, (cop - ci) if pad_in else 0), (0, cop - co)))
    return w.reshape(kh * kw, w.shape[2], cop).astype(jnp.bfloat16)


def _prep_w1x1(w_hwio, cop):
    ci, co = w_hwio.shape[2], w_hwio.shape[3]
    w = jnp.pad(w_hwio.reshape(ci, co), ((0, cop - ci), (0, cop - co)))
    return w.astype(jnp.bfloat16)


def _fold_bn(conv_bias, bn_params, cop):
    """Fold conv bias + inference-mode BN into per-channel scale/shift; padded
    channels get scale=shift=0 so they stay exactly zero through the block."""
    gamma, beta, mean, var = bn_params
    scale = gamma / jnp.sqrt(var + _BN_EPS)
    shift = beta + (conv_bias - mean) * scale
    scale = jnp.pad(scale, (0, cop - scale.shape[0]))
    shift = jnp.pad(shift, (0, cop - shift.shape[0]))
    return (scale.reshape(1, cop).astype(jnp.float32),
            shift.reshape(1, cop).astype(jnp.float32))


def _vmem_limit(in_block_bytes, out_block_bytes, resident_bytes, scratch_bytes):
    est = 2 * in_block_bytes + 2 * out_block_bytes + resident_bytes + scratch_bytes
    # keep below v7x's 64 MiB physical VMEM while leaving double-buffer headroom
    return int(min(max(2 * est, 32 * 1024 * 1024), 48 * 1024 * 1024))


# --------------------------------------------------------------------------
# Pallas kernels
# --------------------------------------------------------------------------
def _tap_slab(x_ref, dh, dw, tr, wo, stride):
    """Gather the (tr*wo, Cin) slab for 3x3 tap (dh, dw) from the halo window
    ref of shape (trin, stride, Wq, Cin).  Contiguous reads only (W was
    phase-split by `stride` in the wrapper); gather stays entirely in VMEM."""
    phase, off = dw % stride, dw // stride
    rows = [x_ref[t * stride + dh, phase, pl.ds(off, wo), :] for t in range(tr)]
    slab = rows[0] if tr == 1 else jnp.concatenate(rows, axis=0)
    return slab.astype(jnp.bfloat16)


def _front_kernel(*refs, tr, wo, stride, has_down):
    """conv1(3x3)+bn1+relu -> conv2(1x1)+bn2+relu; optionally downsample+bn,
    reusing the same activation slabs (one read of the input window)."""
    if has_down:
        (x_ref, w1_ref, w2_ref, wd_ref,
         s1_ref, h1_ref, s2_ref, h2_ref, sd_ref, hd_ref,
         y2_ref, idn_ref) = refs
    else:
        (x_ref, w1_ref, w2_ref,
         s1_ref, h1_ref, s2_ref, h2_ref, y2_ref) = refs

    m = tr * wo
    cop = y2_ref.shape[-1]
    acc1 = jnp.zeros((m, cop), jnp.float32)
    accd = jnp.zeros((m, cop), jnp.float32) if has_down else None

    for dh in range(3):
        for dw in range(3):
            slab = _tap_slab(x_ref, dh, dw, tr, wo, stride)      # (m, cin) bf16
            tap = dh * 3 + dw
            acc1 = acc1 + jnp.dot(slab, w1_ref[tap],
                                  preferred_element_type=jnp.float32)
            if has_down:
                accd = accd + jnp.dot(slab, wd_ref[tap],
                                      preferred_element_type=jnp.float32)

    y1 = jnp.maximum(acc1 * s1_ref[...] + h1_ref[...], 0.0)       # bn1 + relu
    y2 = jnp.dot(y1.astype(jnp.bfloat16), w2_ref[...],
                 preferred_element_type=jnp.float32)              # conv2 (1x1)
    y2 = jnp.maximum(y2 * s2_ref[...] + h2_ref[...], 0.0)         # bn2 + relu
    y2_ref[...] = y2.astype(y2_ref.dtype)
    if has_down:
        idn_ref[...] = (accd * sd_ref[...] + hd_ref[...]).astype(idn_ref.dtype)


def _tail_kernel(y_ref, w3_ref, s3_ref, h3_ref, idn_ref, o_ref, *, tr, wo):
    """conv3(3x3, stride 1) + bn3 + residual add + relu."""
    m = tr * wo
    cop = o_ref.shape[-1]
    acc = jnp.zeros((m, cop), jnp.float32)
    for dh in range(3):
        for dw in range(3):
            slab = _tap_slab(y_ref, dh, dw, tr, wo, 1)
            acc = acc + jnp.dot(slab, w3_ref[dh * 3 + dw],
                                preferred_element_type=jnp.float32)
    out = acc * s3_ref[...] + h3_ref[...] + idn_ref[...]
    o_ref[...] = jnp.maximum(out, 0.0).astype(o_ref.dtype)


# --------------------------------------------------------------------------
# FastBlock forward (Pallas)
# --------------------------------------------------------------------------
def fast_block_pallas(x_nchw, params, stride):
    x = jnp.transpose(x_nchw, (0, 2, 3, 1)).astype(jnp.float32)   # NHWC
    n, h, w, cin = x.shape
    cout = params["w1"].shape[-1]
    cop = _round_up(cout, _LANE)                                  # lane-dense Cout
    ho = (h - 1) // stride + 1
    wo = (w - 1) // stride + 1
    has_down = stride > 1

    tr, nblk = _pick_row_block(ho, wo)
    m_blk = tr * wo
    m_tot = n * nblk * m_blk
    grid = (n * nblk,)

    # folded parameters (weights bf16, BN scale/shift f32, Cout padded to cop)
    w1 = _prep_w3x3(params["w1"], cop)
    w2 = _prep_w1x1(params["w2"], cop)
    w3 = _prep_w3x3(params["w3"], cop, pad_in=True)
    s1, h1 = _fold_bn(params["b1"], params["bn1"], cop)
    s2, h2 = _fold_bn(params["b2"], params["bn2"], cop)
    s3, h3 = _fold_bn(params["b3"], params["bn3"], cop)

    # ---------- kernel A: conv1+bn1+relu -> conv2+bn2+relu (+ downsample) ----------
    xh = _halo_rows(x, stride, tr, nblk)          # (n*nblk*trin1, stride, wq1, cin)
    trin1, wq1 = (tr - 1) * stride + 3, xh.shape[2]

    in_specs = [
        pl.BlockSpec((trin1, stride, wq1, cin), lambda i: (i, 0, 0, 0)),
        pl.BlockSpec((9, cin, cop), lambda i: (0, 0, 0)),
        pl.BlockSpec((cop, cop), lambda i: (0, 0)),
    ]
    args = [xh, w1, w2]
    if has_down:
        wd = _prep_w3x3(params["wd"], cop)
        sd, hd = _fold_bn(params["bd"], params["bnd"], cop)
        in_specs.append(pl.BlockSpec((9, cin, cop), lambda i: (0, 0, 0)))
        args.append(wd)
        scales = [s1, h1, s2, h2, sd, hd]
    else:
        scales = [s1, h1, s2, h2]
    vec_spec = pl.BlockSpec((1, cop), lambda i: (0, 0))
    in_specs += [vec_spec] * len(scales)
    args += scales

    out_blk = pl.BlockSpec((m_blk, cop), lambda i: (i, 0))
    y2_shape = jax.ShapeDtypeStruct((m_tot, cop), jnp.float32)
    if has_down:
        out_shape_a = (y2_shape, jax.ShapeDtypeStruct((m_tot, cop), jnp.float32))
        out_specs_a = (out_blk, out_blk)
    else:
        out_shape_a, out_specs_a = y2_shape, out_blk

    n_conv = 2 if has_down else 1
    flops_a = 2 * m_tot * 9 * cin * cop * n_conv + 2 * m_tot * cop * cop
    bytes_a = int(xh.size * 4 + w1.size * 2 * n_conv + w2.size * 2 +
                  sum(a.size for a in scales) * 4 + m_tot * cop * 4 * n_conv)
    vmem_a = _vmem_limit(
        in_block_bytes=trin1 * stride * wq1 * cin * 4,
        out_block_bytes=m_blk * cop * 4 * n_conv,
        resident_bytes=(w1.size * n_conv + w2.size) * 2
        + sum(a.size for a in scales) * 4,
        scratch_bytes=8 * m_blk * cop * 4 + 16 * m_blk * cin * 4,
    )
    res = pl.pallas_call(
        functools.partial(_front_kernel, tr=tr, wo=wo, stride=stride,
                          has_down=has_down),
        out_shape=out_shape_a,
        grid=grid,
        in_specs=in_specs,
        out_specs=out_specs_a,
        compiler_params=pltpu.CompilerParams(
            dimension_semantics=("parallel",), vmem_limit_bytes=vmem_a),
        cost_estimate=pl.CostEstimate(flops=flops_a, transcendentals=0,
                                      bytes_accessed=bytes_a),
    )(*args)

    if has_down:
        y2_flat, idn = res
    else:
        y2_flat = res
        # TODO(synk): the PyTorch module raises for stride == 1 (self._downsample
        # is never defined); we fall back to identity, which needs cin == cout.
        if cin != cout:
            raise ValueError("stride==1 identity path requires in_channels == out_channels")
        xi = jnp.pad(x, ((0, 0), (0, nblk * tr - ho), (0, 0), (0, cop - cin)))
        idn = xi.reshape(m_tot, cop)

    # ---------- kernel B: conv3(3x3, stride 1) + bn3 + residual + relu ----------
    y2_img = y2_flat.reshape(n, nblk * tr, wo, cop)[:, :ho]
    yh = _halo_rows(y2_img, 1, tr, nblk)          # (n*nblk*(tr+2), 1, wo+2, cop)
    trin3, wq3 = tr + 2, yh.shape[2]

    in_specs_b = [
        pl.BlockSpec((trin3, 1, wq3, cop), lambda i: (i, 0, 0, 0)),
        pl.BlockSpec((9, cop, cop), lambda i: (0, 0, 0)),
        vec_spec, vec_spec,
        pl.BlockSpec((m_blk, cop), lambda i: (i, 0)),
    ]
    flops_b = 2 * m_tot * 9 * cop * cop
    bytes_b = int(yh.size * 4 + w3.size * 2 + (s3.size + h3.size) * 4 +
                  m_tot * cop * 4 * 2)
    vmem_b = _vmem_limit(
        in_block_bytes=(trin3 * wq3 + m_blk) * cop * 4,
        out_block_bytes=m_blk * cop * 4,
        resident_bytes=w3.size * 2 + (s3.size + h3.size) * 4,
        scratch_bytes=8 * m_blk * cop * 4,
    )
    out = pl.pallas_call(
        functools.partial(_tail_kernel, tr=tr, wo=wo),
        out_shape=jax.ShapeDtypeStruct((m_tot, cop), jnp.float32),
        grid=grid,
        in_specs=in_specs_b,
        out_specs=pl.BlockSpec((m_blk, cop), lambda i: (i, 0)),
        compiler_params=pltpu.CompilerParams(
            dimension_semantics=("parallel",), vmem_limit_bytes=vmem_b),
        cost_estimate=pl.CostEstimate(flops=flops_b, transcendentals=0,
                                      bytes_accessed=bytes_b),
    )(yh, w3, s3, h3, idn)

    out = out.reshape(n, nblk * tr, wo, cop)[:, :ho, :, :cout]
    return jnp.transpose(out, (0, 3, 1, 2))       # back to NCHW


# --------------------------------------------------------------------------
# parameter init and pure-JAX reference
# --------------------------------------------------------------------------
def init_params(key, cin, cout, stride):
    ks = jax.random.split(key, 12)

    def conv_w(k, kh, kw, ci, co):
        return 0.1 * jax.random.normal(k, (kh, kw, ci, co), jnp.float32)  # HWIO

    def bias(k):
        return 0.1 * jax.random.normal(k, (cout,), jnp.float32)

    def bn(k):
        k1, k2, k3, k4 = jax.random.split(k, 4)
        gamma = 1.0 + 0.1 * jax.random.normal(k1, (cout,), jnp.float32)
        beta = 0.1 * jax.random.normal(k2, (cout,), jnp.float32)
        mean = 0.1 * jax.random.normal(k3, (cout,), jnp.float32)
        var = jnp.abs(jax.random.normal(k4, (cout,), jnp.float32)) + 0.5
        return gamma, beta, mean, var

    params = {
        "w1": conv_w(ks[0], 3, 3, cin, cout), "b1": bias(ks[1]), "bn1": bn(ks[2]),
        "w2": conv_w(ks[3], 1, 1, cout, cout), "b2": bias(ks[4]), "bn2": bn(ks[5]),
        "w3": conv_w(ks[6], 3, 3, cout, cout), "b3": bias(ks[7]), "bn3": bn(ks[8]),
    }
    if stride > 1:
        params["wd"] = conv_w(ks[9], 3, 3, cin, cout)
        params["bd"] = bias(ks[10])
        params["bnd"] = bn(ks[11])
    return params


def reference_forward(x_nchw, params, stride):
    x = jnp.transpose(x_nchw, (0, 2, 3, 1)).astype(jnp.float32)

    def conv(hh, ww, b, s, pad):
        y = jax.lax.conv_general_dilated(
            hh, ww, (s, s), [(pad, pad), (pad, pad)],
            dimension_numbers=("NHWC", "HWIO", "NHWC"),
        )
        return y + b

    def bn(y, p):
        g, be, m, v = p
        return g * (y - m) / jnp.sqrt(v + _BN_EPS) + be

    out = jax.nn.relu(bn(conv(x, params["w1"], params["b1"], stride, 1), params["bn1"]))
    out = jax.nn.relu(bn(conv(out, params["w2"], params["b2"], 1, 0), params["bn2"]))
    out = bn(conv(out, params["w3"], params["b3"], 1, 1), params["bn3"])
    if stride > 1:
        idn = bn(conv(x, params["wd"], params["bd"], stride, 1), params["bnd"])
    else:
        idn = x
    out = jax.nn.relu(out + idn)
    return jnp.transpose(out, (0, 3, 1, 2))


if __name__ == "__main__":
    key = jax.random.PRNGKey(0)
    kx, kp = jax.random.split(key)

    N, Cin, Cout, H, W, stride = 2, 4, 8, 16, 16, 2
    x = jax.random.normal(kx, (N, Cin, H, W), jnp.float32)
    params = init_params(kp, Cin, Cout, stride)

    out = jax.block_until_ready(fast_block_pallas(x, params, stride))
    ref = reference_forward(x, params, stride)

    assert out.shape == (N, Cout, H // stride, W // stride), out.shape
    max_err = float(jnp.max(jnp.abs(out - ref)))
    # bf16 MXU operands (weights + in-VMEM activation casts) -> looser tolerance
    assert jnp.allclose(out, ref, atol=5e-2, rtol=5e-2), f"max_err={max_err}"

    print("KERNEL_OK")
</pallas_src>

<mosaic_0001>
module attributes {stable_mosaic.version = 11 : i64} {
  func.func @_front_kernel(%arg0: i32, %arg1: memref<17x2x9x4xf32, #tpu.memory_space<vmem>>, %arg2: memref<9x4x128xbf16, #tpu.memory_space<vmem>>, %arg3: memref<128x128xbf16, #tpu.memory_space<vmem>>, %arg4: memref<9x4x128xbf16, #tpu.memory_space<vmem>>, %arg5: memref<1x128xf32, #tpu.memory_space<vmem>>, %arg6: memref<1x128xf32, #tpu.memory_space<vmem>>, %arg7: memref<1x128xf32, #tpu.memory_space<vmem>>, %arg8: memref<1x128xf32, #tpu.memory_space<vmem>>, %arg9: memref<1x128xf32, #tpu.memory_space<vmem>>, %arg10: memref<1x128xf32, #tpu.memory_space<vmem>>, %arg11: memref<64x128xf32, #tpu.memory_space<vmem>>, %arg12: memref<64x128xf32, #tpu.memory_space<vmem>>) attributes {dimension_semantics = [#tpu.dimension_semantics<parallel>], iteration_bounds = array<i64: 2>, scalar_prefetch = 0 : i64, scratch_operands = 0 : i64, tpu.core_type = #tpu.core_type<tc>, window_params = [{transform_indices = @transform_0, window_bounds = array<i64: 17, 2, 9, 4>}, {pipeline_mode = #tpu.pipeline_mode<synchronous>, transform_indices = @transform_1, window_bounds = array<i64: 9, 4, 128>}, {pipeline_mode = #tpu.pipeline_mode<synchronous>, transform_indices = @transform_2, window_bounds = array<i64: 128, 128>}, {pipeline_mode = #tpu.pipeline_mode<synchronous>, transform_indices = @transform_3, window_bounds = array<i64: 9, 4, 128>}, {pipeline_mode = #tpu.pipeline_mode<synchronous>, transform_indices = @transform_4, window_bounds = array<i64: 1, 128>}, {pipeline_mode = #tpu.pipeline_mode<synchronous>, transform_indices = @transform_5, window_bounds = array<i64: 1, 128>}, {pipeline_mode = #tpu.pipeline_mode<synchronous>, transform_indices = @transform_6, window_bounds = array<i64: 1, 128>}, {pipeline_mode = #tpu.pipeline_mode<synchronous>, transform_indices = @transform_7, window_bounds = array<i64: 1, 128>}, {pipeline_mode = #tpu.pipeline_mode<synchronous>, transform_indices = @transform_8, window_bounds = array<i64: 1, 128>}, {pipeline_mode = #tpu.pipeline_mode<synchronous>, transform_indices = @transform_9, window_bounds = array<i64: 1, 128>}, {transform_indices = @transform_10, window_bounds = array<i64: 64, 128>}, {transform_indices = @transform_11, window_bounds = array<i64: 64, 128>}]} {
    %cst = arith.constant 0.000000e+00 : f32
    %0 = vector.broadcast %cst : f32 to vector<64x128xf32>
    %cst_0 = arith.constant 0.000000e+00 : f32
    %1 = vector.broadcast %cst_0 : f32 to vector<64x128xf32>
    %c0 = arith.constant 0 : index
    %c0_1 = arith.constant 0 : index
    %c0_2 = arith.constant 0 : index
    %c0_3 = arith.constant 0 : index
    %2 = vector.load %arg1[%c0, %c0_1, %c0_2, %c0_3] : memref<17x2x9x4xf32, #tpu.memory_space<vmem>>, vector<1x1x8x4xf32>
    %3 = vector.shape_cast %2 : vector<1x1x8x4xf32> to vector<8x4xf32>
    %c2 = arith.constant 2 : index
    %c0_4 = arith.constant 0 : index
    %c0_5 = arith.constant 0 : index
    %c0_6 = arith.constant 0 : index
    %4 = vector.load %arg1[%c2, %c0_4, %c0_5, %c0_6] : memref<17x2x9x4xf32, #tpu.memory_space<vmem>>, vector<1x1x8x4xf32>
    %5 = vector.shape_cast %4 : vector<1x1x8x4xf32> to vector<8x4xf32>
    %c4 = arith.constant 4 : index
    %c0_7 = arith.constant 0 : index
    %c0_8 = arith.constant 0 : index
    %c0_9 = arith.constant 0 : index
    %6 = vector.load %arg1[%c4, %c0_7, %c0_8, %c0_9] : memref<17x2x9x4xf32, #tpu.memory_space<vmem>>, vector<1x1x8x4xf32>
    %7 = vector.shape_cast %6 : vector<1x1x8x4xf32> to vector<8x4xf32>
    %c6 = arith.constant 6 : index
    %c0_10 = arith.constant 0 : index
    %c0_11 = arith.constant 0 : index
    %c0_12 = arith.constant 0 : index
    %8 = vector.load %arg1[%c6, %c0_10, %c0_11, %c0_12] : memref<17x2x9x4xf32, #tpu.memory_space<vmem>>, vector<1x1x8x4xf32>
    %9 = vector.shape_cast %8 : vector<1x1x8x4xf32> to vector<8x4xf32>
    %c8 = arith.constant 8 : index
    %c0_13 = arith.constant 0 : index
    %c0_14 = arith.constant 0 : index
    %c0_15 = arith.constant 0 : index
    %10 = vector.load %arg1[%c8, %c0_13, %c0_14, %c0_15] : memref<17x2x9x4xf32, #tpu.memory_space<vmem>>, vector<1x1x8x4xf32>
    %11 = vector.shape_cast %10 : vector<1x1x8x4xf32> to vector<8x4xf32>
    %c10 = arith.constant 10 : index
    %c0_16 = arith.constant 0 : index
    %c0_17 = arith.constant 0 : index
    %c0_18 = arith.constant 0 : index
    %12 = vector.load %arg1[%c10, %c0_16, %c0_17, %c0_18] : memref<17x2x9x4xf32, #tpu.memory_space<vmem>>, vector<1x1x8x4xf32>
    %13 = vector.shape_cast %12 : vector<1x1x8x4xf32> to vector<8x4xf32>
    %c12 = arith.constant 12 : index
    %c0_19 = arith.constant 0 : index
    %c0_20 = arith.constant 0 : index
    %c0_21 = arith.constant 0 : index
    %14 = vector.load %arg1[%c12, %c0_19, %c0_20, %c0_21] : memref<17x2x9x4xf32, #tpu.memory_space<vmem>>, vector<1x1x8x4xf32>
    %15 = vector.shape_cast %14 : vector<1x1x8x4xf32> to vector<8x4xf32>
    %c14 = arith.constant 14 : index
    %c0_22 = arith.constant 0 : index
    %c0_23 = arith.constant 0 : index
    %c0_24 = arith.constant 0 : index
    %16 = vector.load %arg1[%c14, %c0_22, %c0_23, %c0_24] : memref<17x2x9x4xf32, #tpu.memory_space<vmem>>, vector<1x1x8x4xf32>
    %17 = vector.shape_cast %16 : vector<1x1x8x4xf32> to vector<8x4xf32>
    %18 = tpu.concatenate %3, %5, %7, %9, %11, %13, %15, %17 in 0 : vector<8x4xf32>, vector<8x4xf32>, vector<8x4xf32>, vector<8x4xf32>, vector<8x4xf32>, vector<8x4xf32>, vector<8x4xf32>, vector<8x4xf32> -> vector<64x4xf32>
    %19 = arith.truncf %18 : vector<64x4xf32> to vector<64x4xbf16>
    %c0_25 = arith.constant 0 : index
    %c0_26 = arith.constant 0 : index
    %c0_27 = arith.constant 0 : index
    %20 = vector.load %arg2[%c0_25, %c0_26, %c0_27] : memref<9x4x128xbf16, #tpu.memory_space<vmem>>, vector<1x4x128xbf16>
    %21 = vector.shape_cast %20 : vector<1x4x128xbf16> to vector<4x128xbf16>
    %cst_28 = arith.constant dense<0.000000e+00> : vector<64x128xf32>
    %22 = tpu.matmul %19, %21, %cst_28 {dimension_numbers = #tpu.dot_dimension_numbers<[1], [0], [0], [1], [0, 0, 1, 1], [], []>} : vector<64x4xbf16>, vector<4x128xbf16>, vector<64x128xf32> -> vector<64x128xf32>
    %23 = arith.addf %0, %22 : vector<64x128xf32>
    %c0_29 = arith.constant 0 : index
    %c0_30 = arith.constant 0 : index
    %c0_31 = arith.constant 0 : index
    %24 = vector.load %arg4[%c0_29, %c0_30, %c0_31] : memref<9x4x128xbf16, #tpu.memory_space<vmem>>, vector<1x4x128xbf16>
    %25 = vector.shape_cast %24 : vector<1x4x128xbf16> to vector<4x128xbf16>
    %cst_32 = arith.constant dense<0.000000e+00> : vector<64x128xf32>
    %26 = tpu.matmul %19, %25, %cst_32 {dimension_numbers = #tpu.dot_dimension_numbers<[1], [0], [0], [1], [0, 0, 1, 1], [], []>} : vector<64x4xbf16>, vector<4x128xbf16>, vector<64x128xf32> -> vector<64x128xf32>
    %27 = arith.addf %1, %26 : vector<64x128xf32>
    %c0_33 = arith.constant 0 : index
    %c1 = arith.constant 1 : index
    %c0_34 = arith.constant 0 : index
    %c0_35 = arith.constant 0 : index
    %28 = vector.load %arg1[%c0_33, %c1, %c0_34, %c0_35] : memref<17x2x9x4xf32, #tpu.memory_space<vmem>>, vector<1x1x8x4xf32>
    %29 = vector.shape_cast %28 : vector<1x1x8x4xf32> to vector<8x4xf32>
    %c2_36 = arith.constant 2 : index
    %c1_37 = arith.constant 1 : index
    %c0_38 = arith.constant 0 : index
    %c0_39 = arith.constant 0 : index
    %30 = vector.load %arg1[%c2_36, %c1_37, %c0_38, %c0_39] : memref<17x2x9x4xf32, #tpu.memory_space<vmem>>, vector<1x1x8x4xf32>
    %31 = vector.shape_cast %30 : vector<1x1x8x4xf32> to vector<8x4xf32>
    %c4_40 = arith.constant 4 : index
    %c1_41 = arith.constant 1 : index
    %c0_42 = arith.constant 0 : index
    %c0_43 = arith.constant 0 : index
    %32 = vector.load %arg1[%c4_40, %c1_41, %c0_42, %c0_43] : memref<17x2x9x4xf32, #tpu.memory_space<vmem>>, vector<1x1x8x4xf32>
    %33 = vector.shape_cast %32 : vector<1x1x8x4xf32> to vector<8x4xf32>
    %c6_44 = arith.constant 6 : index
    %c1_45 = arith.constant 1 : index
    %c0_46 = arith.constant 0 : index
    %c0_47 = arith.constant 0 : index
    %34 = vector.load %arg1[%c6_44, %c1_45, %c0_46, %c0_47] : memref<17x2x9x4xf32, #tpu.memory_space<vmem>>, vector<1x1x8x4xf32>
    %35 = vector.shape_cast %34 : vector<1x1x8x4xf32> to vector<8x4xf32>
    %c8_48 = arith.constant 8 : index
    %c1_49 = arith.constant 1 : index
    %c0_50 = arith.constant 0 : index
    %c0_51 = arith.constant 0 : index
    %36 = vector.load %arg1[%c8_48, %c1_49, %c0_50, %c0_51] : memref<17x2x9x4xf32, #tpu.memory_space<vmem>>, vector<1x1x8x4xf32>
    %37 = vector.shape_cast %36 : vector<1x1x8x4xf32> to vector<8x4xf32>
    %c10_52 = arith.constant 10 : index
    %c1_53 = arith.constant 1 : index
    %c0_54 = arith.constant 0 : index
    %c0_55 = arith.constant 0 : index
    %38 = vector.load %arg1[%c10_52, %c1_53, %c0_54, %c0_55] : memref<17x2x9x4xf32, #tpu.memory_space<vmem>>, vector<1x1x8x4xf32>
    %39 = vector.shape_cast %38 : vector<1x1x8x4xf32> to vector<8x4xf32>
    %c12_56 = arith.constant 12 : index
    %c1_57 = arith.constant 1 : index
    %c0_58 = arith.constant 0 : index
    %c0_59 = arith.constant 0 : index
    %40 = vector.load %arg1[%c12_56, %c1_57, %c0_58, %c0_59] : memref<17x2x9x4xf32, #tpu.memory_space<vmem>>, vector<1x1x8x4xf32>
    %41 = vector.shape_cast %40 : vector<1x1x8x4xf32> to vector<8x4xf32>
    %c14_60 = arith.constant 14 : index
    %c1_61 = arith.constant 1 : index
    %c0_62 = arith.constant 0 : index
    %c0_63 = arith.constant 0 : index
    %42 = vector.load %arg1[%c14_60, %c1_61, %c0_62, %c0_63] : memref<17x2x9x4xf32, #tpu.memory_space<vmem>>, vector<1x1x8x4xf32>
    %43 = vector.shape_cast %42 : vector<1x1x8x4xf32> to vector<8x4xf32>
    %44 = tpu.concatenate %29, %31, %33, %35, %37, %39, %41, %43 in 0 : vector<8x4xf32>, vector<8x4xf32>, vector<8x4xf32>, vector<8x4xf32>, vector<8x4xf32>, vector<8x4xf32>, vector<8x4xf32>, vector<8x4xf32> -> vector<64x4xf32>
    %45 = arith.truncf %44 : vector<64x4xf32> to vector<64x4xbf16>
    %c1_64 = arith.constant 1 : index
    %c0_65 = arith.constant 0 : index
    %c0_66 = arith.constant 0 : index
    %46 = vector.load %arg2[%c1_64, %c0_65, %c0_66] : memref<9x4x128xbf16, #tpu.memory_space<vmem>>, vector<1x4x128xbf16>
    %47 = vector.shape_cast %46 : vector<1x4x128xbf16> to vector<4x128xbf16>
    %cst_67 = arith.constant dense<0.000000e+00> : vector<64x128xf32>
    %48 = tpu.matmul %45, %47, %cst_67 {dimension_numbers = #tpu.dot_dimension_numbers<[1], [0], [0], [1], [0, 0, 1, 1], [], []>} : vector<64x4xbf16>, vector<4x128xbf16>, vector<64x128xf32> -> vector<64x128xf32>
    %49 = arith.addf %23, %48 : vector<64x128xf32>
    %c1_68 = arith.constant 1 : index
    %c0_69 = arith.constant 0 : index
    %c0_70 = arith.constant 0 : index
    %50 = vector.load %arg4[%c1_68, %c0_69, %c0_70] : memref<9x4x128xbf16, #tpu.memory_space<vmem>>, vector<1x4x128xbf16>
    %51 = vector.shape_cast %50 : vector<1x4x128xbf16> to vector<4x128xbf16>
    %cst_71 = arith.constant dense<0.000000e+00> : vector<64x128xf32>
    %52 = tpu.matmul %45, %51, %cst_71 {dimension_numbers = #tpu.dot_dimension_numbers<[1], [0], [0], [1], [0, 0, 1, 1], [], []>} : vector<64x4xbf16>, vector<4x128xbf16>, vector<64x128xf32> -> vector<64x128xf32>
    %53 = arith.addf %27, %52 : vector<64x128xf32>
    %c0_72 = arith.constant 0 : index
    %c0_73 = arith.constant 0 : index
    %c1_74 = arith.constant 1 : index
    %c0_75 = arith.constant 0 : index
    %54 = vector.load %arg1[%c0_72, %c0_73, %c1_74, %c0_75] : memref<17x2x9x4xf32, #tpu.memory_space<vmem>>, vector<1x1x8x4xf32>
    %55 = vector.shape_cast %54 : vector<1x1x8x4xf32> to vector<8x4xf32>
    %c2_76 = arith.constant 2 : index
    %c0_77 = arith.constant 0 : index
    %c1_78 = arith.constant 1 : index
    %c0_79 = arith.constant 0 : index
    %56 = vector.load %arg1[%c2_76, %c0_77, %c1_78, %c0_79] : memref<17x2x9x4xf32, #tpu.memory_space<vmem>>, vector<1x1x8x4xf32>
    %57 = vector.shape_cast %56 : vector<1x1x8x4xf32> to vector<8x4xf32>
    %c4_80 = arith.constant 4 : index
    %c0_81 = arith.constant 0 : index
    %c1_82 = arith.constant 1 : index
    %c0_83 = arith.constant 0 : index
    %58 = vector.load %arg1[%c4_80, %c0_81, %c1_82, %c0_83] : memref<17x2x9x4xf32, #tpu.memory_space<vmem>>, vector<1x1x8x4xf32>
    %59 = vector.shape_cast %58 : vector<1x1x8x4xf32> to vector<8x4xf32>
    %c6_84 = arith.constant 6 : index
    %c0_85 = arith.constant 0 : index
    %c1_86 = arith.constant 1 : index
    %c0_87 = arith.constant 0 : index
    %60 = vector.load %arg1[%c6_84, %c0_85, %c1_86, %c0_87] : memref<17x2x9x4xf32, #tpu.memory_space<vmem>>, vector<1x1x8x4xf32>
    %61 = vector.shape_cast %60 : vector<1x1x8x4xf32> to vector<8x4xf32>
    %c8_88 = arith.constant 8 : index
    %c0_89 = arith.constant 0 : index
    %c1_90 = arith.constant 1 : index
    %c0_91 = arith.constant 0 : index
    %62 = vector.load %arg1[%c8_88, %c0_89, %c1_90, %c0_91] : memref<17x2x9x4xf32, #tpu.memory_space<vmem>>, vector<1x1x8x4xf32>
    %63 = vector.shape_cast %62 : vector<1x1x8x4xf32> to vector<8x4xf32>
    %c10_92 = arith.constant 10 : index
    %c0_93 = arith.constant 0 : index
    %c1_94 = arith.constant 1 : index
    %c0_95 = arith.constant 0 : index
    %64 = vector.load %arg1[%c10_92, %c0_93, %c1_94, %c0_95] : memref<17x2x9x4xf32, #tpu.memory_space<vmem>>, vector<1x1x8x4xf32>
    %65 = vector.shape_cast %64 : vector<1x1x8x4xf32> to vector<8x4xf32>
    %c12_96 = arith.constant 12 : index
    %c0_97 = arith.constant 0 : index
    %c1_98 = arith.constant 1 : index
    %c0_99 = arith.constant 0 : index
    %66 = vector.load %arg1[%c12_96, %c0_97, %c1_98, %c0_99] : memref<17x2x9x4xf32, #tpu.memory_space<vmem>>, vector<1x1x8x4xf32>
    %67 = vector.shape_cast %66 : vector<1x1x8x4xf32> to vector<8x4xf32>
    %c14_100 = arith.constant 14 : index
    %c0_101 = arith.constant 0 : index
    %c1_102 = arith.constant 1 : index
    %c0_103 = arith.constant 0 : index
    %68 = vector.load %arg1[%c14_100, %c0_101, %c1_102, %c0_103] : memref<17x2x9x4xf32, #tpu.memory_space<vmem>>, vector<1x1x8x4xf32>
    %69 = vector.shape_cast %68 : vector<1x1x8x4xf32> to vector<8x4xf32>
    %70 = tpu.concatenate %55, %57, %59, %61, %63, %65, %67, %69 in 0 : vector<8x4xf32>, vector<8x4xf32>, vector<8x4xf32>, vector<8x4xf32>, vector<8x4xf32>, vector<8x4xf32>, vector<8x4xf32>, vector<8x4xf32> -> vector<64x4xf32>
    %71 = arith.truncf %70 : vector<64x4xf32> to vector<64x4xbf16>
    %c2_104 = arith.constant 2 : index
    %c0_105 = arith.constant 0 : index
    %c0_106 = arith.constant 0 : index
    %72 = vector.load %arg2[%c2_104, %c0_105, %c0_106] : memref<9x4x128xbf16, #tpu.memory_space<vmem>>, vector<1x4x128xbf16>
    %73 = vector.shape_cast %72 : vector<1x4x128xbf16> to vector<4x128xbf16>
    %cst_107 = arith.constant dense<0.000000e+00> : vector<64x128xf32>
    %74 = tpu.matmul %71, %73, %cst_107 {dimension_numbers = #tpu.dot_dimension_numbers<[1], [0], [0], [1], [0, 0, 1, 1], [], []>} : vector<64x4xbf16>, vector<4x128xbf16>, vector<64x128xf32> -> vector<64x128xf32>
    %75 = arith.addf %49, %74 : vector<64x128xf32>
    %c2_108 = arith.constant 2 : index
    %c0_109 = arith.constant 0 : index
    %c0_110 = arith.constant 0 : index
    %76 = vector.load %arg4[%c2_108, %c0_109, %c0_110] : memref<9x4x128xbf16, #tpu.memory_space<vmem>>, vector<1x4x128xbf16>
    %77 = vector.shape_cast %76 : vector<1x4x128xbf16> to vector<4x128xbf16>
    %cst_111 = arith.constant dense<0.000000e+00> : vector<64x128xf32>
    %78 = tpu.matmul %71, %77, %cst_111 {dimension_numbers = #tpu.dot_dimension_numbers<[1], [0], [0], [1], [0, 0, 1, 1], [], []>} : vector<64x4xbf16>, vector<4x128xbf16>, vector<64x128xf32> -> vector<64x128xf32>
    %79 = arith.addf %53, %78 : vector<64x128xf32>
    %c1_112 = arith.constant 1 : index
    %c0_113 = arith.constant 0 : index
    %c0_114 = arith.constant 0 : index
    %c0_115 = arith.constant 0 : index
    %80 = vector.load %arg1[%c1_112, %c0_113, %c0_114, %c0_115] : memref<17x2x9x4xf32, #tpu.memory_space<vmem>>, vector<1x1x8x4xf32>
    %81 = vector.shape_cast %80 : vector<1x1x8x4xf32> to vector<8x4xf32>
    %c3 = arith.constant 3 : index
    %c0_116 = arith.constant 0 : index
    %c0_117 = arith.constant 0 : index
    %c0_118 = arith.constant 0 : index
    %82 = vector.load %arg1[%c3, %c0_116, %c0_117, %c0_118] : memref<17x2x9x4xf32, #tpu.memory_space<vmem>>, vector<1x1x8x4xf32>
    %83 = vector.shape_cast %82 : vector<1x1x8x4xf32> to vector<8x4xf32>
    %c5 = arith.constant 5 : index
    %c0_119 = arith.constant 0 : index
    %c0_120 = arith.constant 0 : index
    %c0_121 = arith.constant 0 : index
    %84 = vector.load %arg1[%c5, %c0_119, %c0_120, %c0_121] : memref<17x2x9x4xf32, #tpu.memory_space<vmem>>, vector<1x1x8x4xf32>
    %85 = vector.shape_cast %84 : vector<1x1x8x4xf32> to vector<8x4xf32>
    %c7 = arith.constant 7 : index
    %c0_122 = arith.constant 0 : index
    %c0_123 = arith.constant 0 : index
    %c0_124 = arith.constant 0 : index
    %86 = vector.load %arg1[%c7, %c0_122, %c0_123, %c0_124] : memref<17x2x9x4xf32, #tpu.memory_space<vmem>>, vector<1x1x8x4xf32>
    %87 = vector.shape_cast %86 : vector<1x1x8x4xf32> to vector<8x4xf32>
    %c9 = arith.constant 9 : index
    %c0_125 = arith.constant 0 : index
    %c0_126 = arith.constant 0 : index
    %c0_127 = arith.constant 0 : index
    %88 = vector.load %arg1[%c9, %c0_125, %c0_126, %c0_127] : memref<17x2x9x4xf32, #tpu.memory_space<vmem>>, vector<1x1x8x4xf32>
    %89 = vector.shape_cast %88 : vector<1x1x8x4xf32> to vector<8x4xf32>
    %c11 = arith.constant 11 : index
    %c0_128 = arith.constant 0 : index
    %c0_129 = arith.constant 0 : index
    %c0_130 = arith.constant 0 : index
    %90 = vector.load %arg1[%c11, %c0_128, %c0_129, %c0_130] : memref<17x2x9x4xf32, #tpu.memory_space<vmem>>, vector<1x1x8x4xf32>
    %91 = vector.shape_cast %90 : vector<1x1x8x4xf32> to vector<8x4xf32>
    %c13 = arith.constant 13 : index
    %c0_131 = arith.constant 0 : index
    %c0_132 = arith.constant 0 : index
    %c0_133 = arith.constant 0 : index
    %92 = vector.load %arg1[%c13, %c0_131, %c0_132, %c0_133] : memref<17x2x9x4xf32, #tpu.memory_space<vmem>>, vector<1x1x8x4xf32>
    %93 = vector.shape_cast %92 : vector<1x1x8x4xf32> to vector<8x4xf32>
    %c15 = arith.constant 15 : index
    %c0_134 = arith.constant 0 : index
    %c0_135 = arith.constant 0 : index
    %c0_136 = arith.constant 0 : index
    %94 = vector.load %arg1[%c15, %c0_134, %c0_135, %c0_136] : memref<17x2x9x4xf32, #tpu.memory_space<vmem>>, vector<1x1x8x4xf32>
    %95 = vector.shape_cast %94 : vector<1x1x8x4xf32> to vector<8x4xf32>
    %96 = tpu.concatenate %81, %83, %85, %87, %89, %91, %93, %95 in 0 : vector<8x4xf32>, vector<8x4xf32>, vector<8x4xf32>, vector<8x4xf32>, vector<8x4xf32>, vector<8x4xf32>, vector<8x4xf32>, vector<8x4xf32> -> vector<64x4xf32>
    %97 = arith.truncf %96 : vector<64x4xf32> to vector<64x4xbf16>
    %c3_137 = arith.constant 3 : index
    %c0_138 = arith.constant 0 : index
    %c0_139 = arith.constant 0 : index
    %98 = vector.load %arg2[%c3_137, %c0_138, %c0_139] : memref<9x4x128xbf16, #tpu.memory_space<vmem>>, vector<1x4x128xbf16>
    %99 = vector.shape_cast %98 : vector<1x4x128xbf16> to vector<4x128xbf16>
    %cst_140 = arith.constant dense<0.000000e+00> : vector<64x128xf32>
    %100 = tpu.matmul %97, %99, %cst_140 {dimension_numbers = #tpu.dot_dimension_numbers<[1], [0], [0], [1], [0, 0, 1, 1], [], []>} : vector<64x4xbf16>, vector<4x128xbf16>, vector<64x128xf32> -> vector<64x128xf32>
    %101 = arith.addf %75, %100 : vector<64x128xf32>
    %c3_141 = arith.constant 3 : index
    %c0_142 = arith.constant 0 : index
    %c0_143 = arith.constant 0 : index
    %102 = vector.load %arg4[%c3_141, %c0_142, %c0_143] : memref<9x4x128xbf16, #tpu.memory_space<vmem>>, vector<1x4x128xbf16>
    %103 = vector.shape_cast %102 : vector<1x4x128xbf16> to vector<4x128xbf16>
    %cst_144 = arith.constant dense<0.000000e+00> : vector<64x128xf32>
    %104 = tpu.matmul %97, %103, %cst_144 {dimension_numbers = #tpu.dot_dimension_numbers<[1], [0], [0], [1], [0, 0, 1, 1], [], []>} : vector<64x4xbf16>, vector<4x128xbf16>, vector<64x128xf32> -> vector<64x128xf32>
    %105 = arith.addf %79, %104 : vector<64x128xf32>
    %c1_145 = arith.constant 1 : index
    %c1_146 = arith.constant 1 : index
    %c0_147 = arith.constant 0 : index
    %c0_148 = arith.constant 0 : index
    %106 = vector.load %arg1[%c1_145, %c1_146, %c0_147, %c0_148] : memref<17x2x9x4xf32, #tpu.memory_space<vmem>>, vector<1x1x8x4xf32>
    %107 = vector.shape_cast %106 : vector<1x1x8x4xf32> to vector<8x4xf32>
    %c3_149 = arith.constant 3 : index
    %c1_150 = arith.constant 1 : index
    %c0_151 = arith.constant 0 : index
    %c0_152 = arith.constant 0 : index
    %108 = vector.load %arg1[%c3_149, %c1_150, %c0_151, %c0_152] : memref<17x2x9x4xf32, #tpu.memory_space<vmem>>, vector<1x1x8x4xf32>
    %109 = vector.shape_cast %108 : vector<1x1x8x4xf32> to vector<8x4xf32>
    %c5_153 = arith.constant 5 : index
    %c1_154 = arith.constant 1 : index
    %c0_155 = arith.constant 0 : index
    %c0_156 = arith.constant 0 : index
    %110 = vector.load %arg1[%c5_153, %c1_154, %c0_155, %c0_156] : memref<17x2x9x4xf32, #tpu.memory_space<vmem>>, vector<1x1x8x4xf32>
    %111 = vector.shape_cast %110 : vector<1x1x8x4xf32> to vector<8x4xf32>
    %c7_157 = arith.constant 7 : index
    %c1_158 = arith.constant 1 : index
    %c0_159 = arith.constant 0 : index
    %c0_160 = arith.constant 0 : index
    %112 = vector.load %arg1[%c7_157, %c1_158, %c0_159, %c0_160] : memref<17x2x9x4xf32, #tpu.memory_space<vmem>>, vector<1x1x8x4xf32>
    %113 = vector.shape_cast %112 : vector<1x1x8x4xf32> to vector<8x4xf32>
    %c9_161 = arith.constant 9 : index
    %c1_162 = arith.constant 1 : index
    %c0_163 = arith.constant 0 : index
    %c0_164 = arith.constant 0 : index
    %114 = vector.load %arg1[%c9_161, %c1_162, %c0_163, %c0_164] : memref<17x2x9x4xf32, #tpu.memory_space<vmem>>, vector<1x1x8x4xf32>
    %115 = vector.shape_cast %114 : vector<1x1x8x4xf32> to vector<8x4xf32>
    %c11_165 = arith.constant 11 : index
    %c1_166 = arith.constant 1 : index
    %c0_167 = arith.constant 0 : index
    %c0_168 = arith.constant 0 : index
    %116 = vector.load %arg1[%c11_165, %c1_166, %c0_167, %c0_168] : memref<17x2x9x4xf32, #tpu.memory_space<vmem>>, vector<1x1x8x4xf32>
    %117 = vector.shape_cast %116 : vector<1x1x8x4xf32> to vector<8x4xf32>
    %c13_169 = arith.constant 13 : index
    %c1_170 = arith.constant 1 : index
    %c0_171 = arith.constant 0 : index
    %c0_172 = arith.constant 0 : index
    %118 = vector.load %arg1[%c13_169, %c1_170, %c0_171, %c0_172] : memref<17x2x9x4xf32, #tpu.memory_space<vmem>>, vector<1x1x8x4xf32>
    %119 = vector.shape_cast %118 : vector<1x1x8x4xf32> to vector<8x4xf32>
    %c15_173 = arith.constant 15 : index
    %c1_174 = arith.constant 1 : index
    %c0_175 = arith.constant 0 : index
    %c0_176 = arith.constant 0 : index
    %120 = vector.load %arg1[%c15_173, %c1_174, %c0_175, %c0_176] : memref<17x2x9x4xf32, #tpu.memory_space<vmem>>, vector<1x1x8x4xf32>
    %121 = vector.shape_cast %120 : vector<1x1x8x4xf32> to vector<8x4xf32>
    %122 = tpu.concatenate %107, %109, %111, %113, %115, %117, %119, %121 in 0 : vector<8x4xf32>, vector<8x4xf32>, vector<8x4xf32>, vector<8x4xf32>, vector<8x4xf32>, vector<8x4xf32>, vector<8x4xf32>, vector<8x4xf32> -> vector<64x4xf32>
    %123 = arith.truncf %122 : vector<64x4xf32> to vector<64x4xbf16>
    %c4_177 = arith.constant 4 : index
    %c0_178 = arith.constant 0 : index
    %c0_179 = arith.constant 0 : index
    %124 = vector.load %arg2[%c4_177, %c0_178, %c0_179] : memref<9x4x128xbf16, #tpu.memory_space<vmem>>, vector<1x4x128xbf16>
    %125 = vector.shape_cast %124 : vector<1x4x128xbf16> to vector<4x128xbf16>
    %cst_180 = arith.constant dense<0.000000e+00> : vector<64x128xf32>
    %126 = tpu.matmul %123, %125, %cst_180 {dimension_numbers = #tpu.dot_dimension_numbers<[1], [0], [0], [1], [0, 0, 1, 1], [], []>} : vector<64x4xbf16>, vector<4x128xbf16>, vector<64x128xf32> -> vector<64x128xf32>
    %127 = arith.addf %101, %126 : vector<64x128xf32>
    %c4_181 = arith.constant 4 : index
    %c0_182 = arith.constant 0 : index
    %c0_183 = arith.constant 0 : index
    %128 = vector.load %arg4[%c4_181, %c0_182, %c0_183] : memref<9x4x128xbf16, #tpu.memory_space<vmem>>, vector<1x4x128xbf16>
    %129 = vector.shape_cast %128 : vector<1x4x128xbf16> to vector<4x128xbf16>
    %cst_184 = arith.constant dense<0.000000e+00> : vector<64x128xf32>
    %130 = tpu.matmul %123, %129, %cst_184 {dimension_numbers = #tpu.dot_dimension_numbers<[1], [0], [0], [1], [0, 0, 1, 1], [], []>} : vector<64x4xbf16>, vector<4x128xbf16>, vector<64x128xf32> -> vector<64x128xf32>
    %131 = arith.addf %105, %130 : vector<64x128xf32>
    %c1_185 = arith.constant 1 : index
    %c0_186 = arith.constant 0 : index
    %c1_187 = arith.constant 1 : index
    %c0_188 = arith.constant 0 : index
    %132 = vector.load %arg1[%c1_185, %c0_186, %c1_187, %c0_188] : memref<17x2x9x4xf32, #tpu.memory_space<vmem>>, vector<1x1x8x4xf32>
    %133 = vector.shape_cast %132 : vector<1x1x8x4xf32> to vector<8x4xf32>
    %c3_189 = arith.constant 3 : index
    %c0_190 = arith.constant 0 : index
    %c1_191 = arith.constant 1 : index
    %c0_192 = arith.constant 0 : index
    %134 = vector.load %arg1[%c3_189, %c0_190, %c1_191, %c0_192] : memref<17x2x9x4xf32, #tpu.memory_space<vmem>>, vector<1x1x8x4xf32>
    %135 = vector.shape_cast %134 : vector<1x1x8x4xf32> to vector<8x4xf32>
    %c5_193 = arith.constant 5 : index
    %c0_194 = arith.constant 0 : index
    %c1_195 = arith.constant 1 : index
    %c0_196 = arith.constant 0 : index
    %136 = vector.load %arg1[%c5_193, %c0_194, %c1_195, %c0_196] : memref<17x2x9x4xf32, #tpu.memory_space<vmem>>, vector<1x1x8x4xf32>
    %137 = vector.shape_cast %136 : vector<1x1x8x4xf32> to vector<8x4xf32>
    %c7_197 = arith.constant 7 : index
    %c0_198 = arith.constant 0 : index
    %c1_199 = arith.constant 1 : index
    %c0_200 = arith.constant 0 : index
    %138 = vector.load %arg1[%c7_197, %c0_198, %c1_199, %c0_200] : memref<17x2x9x4xf32, #tpu.memory_space<vmem>>, vector<1x1x8x4xf32>
    %139 = vector.shape_cast %138 : vector<1x1x8x4xf32> to vector<8x4xf32>
    %c9_201 = arith.constant 9 : index
    %c0_202 = arith.constant 0 : index
    %c1_203 = arith.constant 1 : index
    %c0_204 = arith.constant 0 : index
    %140 = vector.load %arg1[%c9_201, %c0_202, %c1_203, %c0_204] : memref<17x2x9x4xf32, #tpu.memory_space<vmem>>, vector<1x1x8x4xf32>
    %141 = vector.shape_cast %140 : vector<1x1x8x4xf32> to vector<8x4xf32>
    %c11_205 = arith.constant 11 : index
    %c0_206 = arith.constant 0 : index
    %c1_207 = arith.constant 1 : index
    %c0_208 = arith.constant 0 : index
    %142 = vector.load %arg1[%c11_205, %c0_206, %c1_207, %c0_208] : memref<17x2x9x4xf32, #tpu.memory_space<vmem>>, vector<1x1x8x4xf32>
    %143 = vector.shape_cast %142 : vector<1x1x8x4xf32> to vector<8x4xf32>
    %c13_209 = arith.constant 13 : index
    %c0_210 = arith.constant 0 : index
    %c1_211 = arith.constant 1 : index
    %c0_212 = arith.constant 0 : index
    %144 = vector.load %arg1[%c13_209, %c0_210, %c1_211, %c0_212] : memref<17x2x9x4xf32, #tpu.memory_space<vmem>>, vector<1x1x8x4xf32>
    %145 = vector.shape_cast %144 : vector<1x1x8x4xf32> to vector<8x4xf32>
    %c15_213 = arith.constant 15 : index
    %c0_214 = arith.constant 0 : index
    %c1_215 = arith.constant 1 : index
    %c0_216 = arith.constant 0 : index
    %146 = vector.load %arg1[%c15_213, %c0_214, %c1_215, %c0_216] : memref<17x2x9x4xf32, #tpu.memory_space<vmem>>, vector<1x1x8x4xf32>
    %147 = vector.shape_cast %146 : vector<1x1x8x4xf32> to vector<8x4xf32>
    %148 = tpu.concatenate %133, %135, %137, %139, %141, %143, %145, %147 in 0 : vector<8x4xf32>, vector<8x4xf32>, vector<8x4xf32>, vector<8x4xf32>, vector<8x4xf32>, vector<8x4xf32>, vector<8x4xf32>, vector<8x4xf32> -> vector<64x4xf32>
    %149 = arith.truncf %148 : vector<64x4xf32> to vector<64x4xbf16>
    %c5_217 = arith.constant 5 : index
    %c0_218 = arith.constant 0 : index
    %c0_219 = arith.constant 0 : index
    %150 = vector.load %arg2[%c5_217, %c0_218, %c0_219] : memref<9x4x128xbf16, #tpu.memory_space<vmem>>, vector<1x4x128xbf16>
    %151 = vector.shape_cast %150 : vector<1x4x128xbf16> to vector<4x128xbf16>
    %cst_220 = arith.constant dense<0.000000e+00> : vector<64x128xf32>
    %152 = tpu.matmul %149, %151, %cst_220 {dimension_numbers = #tpu.dot_dimension_numbers<[1], [0], [0], [1], [0, 0, 1, 1], [], []>} : vector<64x4xbf16>, vector<4x128xbf16>, vector<64x128xf32> -> vector<64x128xf32>
    %153 = arith.addf %127, %152 : vector<64x128xf32>
    %c5_221 = arith.constant 5 : index
    %c0_222 = arith.constant 0 : index
    %c0_223 = arith.constant 0 : index
    %154 = vector.load %arg4[%c5_221, %c0_222, %c0_223] : memref<9x4x128xbf16, #tpu.memory_space<vmem>>, vector<1x4x128xbf16>
    %155 = vector.shape_cast %154 : vector<1x4x128xbf16> to vector<4x128xbf16>
    %cst_224 = arith.constant dense<0.000000e+00> : vector<64x128xf32>
    %156 = tpu.matmul %149, %155, %cst_224 {dimension_numbers = #tpu.dot_dimension_numbers<[1], [0], [0], [1], [0, 0, 1, 1], [], []>} : vector<64x4xbf16>, vector<4x128xbf16>, vector<64x128xf32> -> vector<64x128xf32>
    %157 = arith.addf %131, %156 : vector<64x128xf32>
    %c2_225 = arith.constant 2 : index
    %c0_226 = arith.constant 0 : index
    %c0_227 = arith.constant 0 : index
    %c0_228 = arith.constant 0 : index
    %158 = vector.load %arg1[%c2_225, %c0_226, %c0_227, %c0_228] : memref<17x2x9x4xf32, #tpu.memory_space<vmem>>, vector<1x1x8x4xf32>
    %159 = vector.shape_cast %158 : vector<1x1x8x4xf32> to vector<8x4xf32>
    %c4_229 = arith.constant 4 : index
    %c0_230 = arith.constant 0 : index
    %c0_231 = arith.constant 0 : index
    %c0_232 = arith.constant 0 : index
    %160 = vector.load %arg1[%c4_229, %c0_230, %c0_231, %c0_232] : memref<17x2x9x4xf32, #tpu.memory_space<vmem>>, vector<1x1x8x4xf32>
    %161 = vector.shape_cast %160 : vector<1x1x8x4xf32> to vector<8x4xf32>
    %c6_233 = arith.constant 6 : index
    %c0_234 = arith.constant 0 : index
    %c0_235 = arith.constant 0 : index
    %c0_236 = arith.constant 0 : index
    %162 = vector.load %arg1[%c6_233, %c0_234, %c0_235, %c0_236] : memref<17x2x9x4xf32, #tpu.memory_space<vmem>>, vector<1x1x8x4xf32>
    %163 = vector.shape_cast %162 : vector<1x1x8x4xf32> to vector<8x4xf32>
    %c8_237 = arith.constant 8 : index
    %c0_238 = arith.constant 0 : index
    %c0_239 = arith.constant 0 : index
    %c0_240 = arith.constant 0 : index
    %164 = vector.load %arg1[%c8_237, %c0_238, %c0_239, %c0_240] : memref<17x2x9x4xf32, #tpu.memory_space<vmem>>, vector<1x1x8x4xf32>
    %165 = vector.shape_cast %164 : vector<1x1x8x4xf32> to vector<8x4xf32>
    %c10_241 = arith.constant 10 : index
    %c0_242 = arith.constant 0 : index
    %c0_243 = arith.constant 0 : index
    %c0_244 = arith.constant 0 : index
    %166 = vector.load %arg1[%c10_241, %c0_242, %c0_243, %c0_244] : memref<17x2x9x4xf32, #tpu.memory_space<vmem>>, vector<1x1x8x4xf32>
    %167 = vector.shape_cast %166 : vector<1x1x8x4xf32> to vector<8x4xf32>
    %c12_245 = arith.constant 12 : index
    %c0_246 = arith.constant 0 : index
    %c0_247 = arith.constant 0 : index
    %c0_248 = arith.constant 0 : index
    %168 = vector.load %arg1[%c12_245, %c0_246, %c0_247, %c0_248] : memref<17x2x9x4xf32, #tpu.memory_space<vmem>>, vector<1x1x8x4xf32>
    %169 = vector.shape_cast %168 : vector<1x1x8x4xf32> to vector<8x4xf32>
    %c14_249 = arith.constant 14 : index
    %c0_250 = arith.constant 0 : index
    %c0_251 = arith.constant 0 : index
    %c0_252 = arith.constant 0 : index
    %170 = vector.load %arg1[%c14_249, %c0_250, %c0_251, %c0_252] : memref<17x2x9x4xf32, #tpu.memory_space<vmem>>, vector<1x1x8x4xf32>
    %171 = vector.shape_cast %170 : vector<1x1x8x4xf32> to vector<8x4xf32>
    %c16 = arith.constant 16 : index
    %c0_253 = arith.constant 0 : index
    %c0_254 = arith.constant 0 : index
    %c0_255 = arith.constant 0 : index
    %172 = vector.load %arg1[%c16, %c0_253, %c0_254, %c0_255] : memref<17x2x9x4xf32, #tpu.memory_space<vmem>>, vector<1x1x8x4xf32>
    %173 = vector.shape_cast %172 : vector<1x1x8x4xf32> to vector<8x4xf32>
    %174 = tpu.concatenate %159, %161, %163, %165, %167, %169, %171, %173 in 0 : vector<8x4xf32>, vector<8x4xf32>, vector<8x4xf32>, vector<8x4xf32>, vector<8x4xf32>, vector<8x4xf32>, vector<8x4xf32>, vector<8x4xf32> -> vector<64x4xf32>
    %175 = arith.truncf %174 : vector<64x4xf32> to vector<64x4xbf16>
    %c6_256 = arith.constant 6 : index
    %c0_257 = arith.constant 0 : index
    %c0_258 = arith.constant 0 : index
    %176 = vector.load %arg2[%c6_256, %c0_257, %c0_258] : memref<9x4x128xbf16, #tpu.memory_space<vmem>>, vector<1x4x128xbf16>
    %177 = vector.shape_cast %176 : vector<1x4x128xbf16> to vector<4x128xbf16>
    %cst_259 = arith.constant dense<0.000000e+00> : vector<64x128xf32>
    %178 = tpu.matmul %175, %177, %cst_259 {dimension_numbers = #tpu.dot_dimension_numbers<[1], [0], [0], [1], [0, 0, 1, 1], [], []>} : vector<64x4xbf16>, vector<4x128xbf16>, vector<64x128xf32> -> vector<64x128xf32>
    %179 = arith.addf %153, %178 : vector<64x128xf32>
    %c6_260 = arith.constant 6 : index
    %c0_261 = arith.constant 0 : index
    %c0_262 = arith.constant 0 : index
    %180 = vector.load %arg4[%c6_260, %c0_261, %c0_262] : memref<9x4x128xbf16, #tpu.memory_space<vmem>>, vector<1x4x128xbf16>
    %181 = vector.shape_cast %180 : vector<1x4x128xbf16> to vector<4x128xbf16>
    %cst_263 = arith.constant dense<0.000000e+00> : vector<64x128xf32>
    %182 = tpu.matmul %175, %181, %cst_263 {dimension_numbers = #tpu.dot_dimension_numbers<[1], [0], [0], [1], [0, 0, 1, 1], [], []>} : vector<64x4xbf16>, vector<4x128xbf16>, vector<64x128xf32> -> vector<64x128xf32>
    %183 = arith.addf %157, %182 : vector<64x128xf32>
    %c2_264 = arith.constant 2 : index
    %c1_265 = arith.constant 1 : index
    %c0_266 = arith.constant 0 : index
    %c0_267 = arith.constant 0 : index
    %184 = vector.load %arg1[%c2_264, %c1_265, %c0_266, %c0_267] : memref<17x2x9x4xf32, #tpu.memory_space<vmem>>, vector<1x1x8x4xf32>
    %185 = vector.shape_cast %184 : vector<1x1x8x4xf32> to vector<8x4xf32>
    %c4_268 = arith.constant 4 : index
    %c1_269 = arith.constant 1 : index
    %c0_270 = arith.constant 0 : index
    %c0_271 = arith.constant 0 : index
    %186 = vector.load %arg1[%c4_268, %c1_269, %c0_270, %c0_271] : memref<17x2x9x4xf32, #tpu.memory_space<vmem>>, vector<1x1x8x4xf32>
    %187 = vector.shape_cast %186 : vector<1x1x8x4xf32> to vector<8x4xf32>
    %c6_272 = arith.constant 6 : index
    %c1_273 = arith.constant 1 : index
    %c0_274 = arith.constant 0 : index
    %c0_275 = arith.constant 0 : index
    %188 = vector.load %arg1[%c6_272, %c1_273, %c0_274, %c0_275] : memref<17x2x9x4xf32, #tpu.memory_space<vmem>>, vector<1x1x8x4xf32>
    %189 = vector.shape_cast %188 : vector<1x1x8x4xf32> to vector<8x4xf32>
    %c8_276 = arith.constant 8 : index
    %c1_277 = arith.constant 1 : index
    %c0_278 = arith.constant 0 : index
    %c0_279 = arith.constant 0 : index
    %190 = vector.load %arg1[%c8_276, %c1_277, %c0_278, %c0_279] : memref<17x2x9x4xf32, #tpu.memory_space<vmem>>, vector<1x1x8x4xf32>
    %191 = vector.shape_cast %190 : vector<1x1x8x4xf32> to vector<8x4xf32>
    %c10_280 = arith.constant 10 : index
    %c1_281 = arith.constant 1 : index
    %c0_282 = arith.constant 0 : index
    %c0_283 = arith.constant 0 : index
    %192 = vector.load %arg1[%c10_280, %c1_281, %c0_282, %c0_283] : memref<17x2x9x4xf32, #tpu.memory_space<vmem>>, vector<1x1x8x4xf32>
    %193 = vector.shape_cast %192 : vector<1x1x8x4xf32> to vector<8x4xf32>
    %c12_284 = arith.constant 12 : index
    %c1_285 = arith.constant 1 : index
    %c0_286 = arith.constant 0 : index
    %c0_287 = arith.constant 0 : index
    %194 = vector.load %arg1[%c12_284, %c1_285, %c0_286, %c0_287] : memref<17x2x9x4xf32, #tpu.memory_space<vmem>>, vector<1x1x8x4xf32>
    %195 = vector.shape_cast %194 : vector<1x1x8x4xf32> to vector<8x4xf32>
    %c14_288 = arith.constant 14 : index
    %c1_289 = arith.constant 1 : index
    %c0_290 = arith.constant 0 : index
    %c0_291 = arith.constant 0 : index
    %196 = vector.load %arg1[%c14_288, %c1_289, %c0_290, %c0_291] : memref<17x2x9x4xf32, #tpu.memory_space<vmem>>, vector<1x1x8x4xf32>
    %197 = vector.shape_cast %196 : vector<1x1x8x4xf32> to vector<8x4xf32>
    %c16_292 = arith.constant 16 : index
    %c1_293 = arith.constant 1 : index
    %c0_294 = arith.constant 0 : index
    %c0_295 = arith.constant 0 : index
    %198 = vector.load %arg1[%c16_292, %c1_293, %c0_294, %c0_295] : memref<17x2x9x4xf32, #tpu.memory_space<vmem>>, vector<1x1x8x4xf32>
    %199 = vector.shape_cast %198 : vector<1x1x8x4xf32> to vector<8x4xf32>
    %200 = tpu.concatenate %185, %187, %189, %191, %193, %195, %197, %199 in 0 : vector<8x4xf32>, vector<8x4xf32>, vector<8x4xf32>, vector<8x4xf32>, vector<8x4xf32>, vector<8x4xf32>, vector<8x4xf32>, vector<8x4xf32> -> vector<64x4xf32>
    %201 = arith.truncf %200 : vector<64x4xf32> to vector<64x4xbf16>
    %c7_296 = arith.constant 7 : index
    %c0_297 = arith.constant 0 : index
    %c0_298 = arith.constant 0 : index
    %202 = vector.load %arg2[%c7_296, %c0_297, %c0_298] : memref<9x4x128xbf16, #tpu.memory_space<vmem>>, vector<1x4x128xbf16>
    %203 = vector.shape_cast %202 : vector<1x4x128xbf16> to vector<4x128xbf16>
    %cst_299 = arith.constant dense<0.000000e+00> : vector<64x128xf32>
    %204 = tpu.matmul %201, %203, %cst_299 {dimension_numbers = #tpu.dot_dimension_numbers<[1], [0], [0], [1], [0, 0, 1, 1], [], []>} : vector<64x4xbf16>, vector<4x128xbf16>, vector<64x128xf32> -> vector<64x128xf32>
    %205 = arith.addf %179, %204 : vector<64x128xf32>
    %c7_300 = arith.constant 7 : index
    %c0_301 = arith.constant 0 : index
    %c0_302 = arith.constant 0 : index
    %206 = vector.load %arg4[%c7_300, %c0_301, %c0_302] : memref<9x4x128xbf16, #tpu.memory_space<vmem>>, vector<1x4x128xbf16>
    %207 = vector.shape_cast %206 : vector<1x4x128xbf16> to vector<4x128xbf16>
    %cst_303 = arith.constant dense<0.000000e+00> : vector<64x128xf32>
    %208 = tpu.matmul %201, %207, %cst_303 {dimension_numbers = #tpu.dot_dimension_numbers<[1], [0], [0], [1], [0, 0, 1, 1], [], []>} : vector<64x4xbf16>, vector<4x128xbf16>, vector<64x128xf32> -> vector<64x128xf32>
    %209 = arith.addf %183, %208 : vector<64x128xf32>
    %c2_304 = arith.constant 2 : index
    %c0_305 = arith.constant 0 : index
    %c1_306 = arith.constant 1 : index
    %c0_307 = arith.constant 0 : index
    %210 = vector.load %arg1[%c2_304, %c0_305, %c1_306, %c0_307] : memref<17x2x9x4xf32, #tpu.memory_space<vmem>>, vector<1x1x8x4xf32>
    %211 = vector.shape_cast %210 : vector<1x1x8x4xf32> to vector<8x4xf32>
    %c4_308 = arith.constant 4 : index
    %c0_309 = arith.constant 0 : index
    %c1_310 = arith.constant 1 : index
    %c0_311 = arith.constant 0 : index
    %212 = vector.load %arg1[%c4_308, %c0_309, %c1_310, %c0_311] : memref<17x2x9x4xf32, #tpu.memory_space<vmem>>, vector<1x1x8x4xf32>
    %213 = vector.shape_cast %212 : vector<1x1x8x4xf32> to vector<8x4xf32>
    %c6_312 = arith.constant 6 : index
    %c0_313 = arith.constant 0 : index
    %c1_314 = arith.constant 1 : index
    %c0_315 = arith.constant 0 : index
    %214 = vector.load %arg1[%c6_312, %c0_313, %c1_314, %c0_315] : memref<17x2x9x4xf32, #tpu.memory_space<vmem>>, vector<1x1x8x4xf32>
    %215 = vector.shape_cast %214 : vector<1x1x8x4xf32> to vector<8x4xf32>
    %c8_316 = arith.constant 8 : index
    %c0_317 = arith.constant 0 : index
    %c1_318 = arith.constant 1 : index
    %c0_319 = arith.constant 0 : index
    %216 = vector.load %arg1[%c8_316, %c0_317, %c1_318, %c0_319] : memref<17x2x9x4xf32, #tpu.memory_space<vmem>>, vector<1x1x8x4xf32>
    %217 = vector.shape_cast %216 : vector<1x1x8x4xf32> to vector<8x4xf32>
    %c10_320 = arith.constant 10 : index
    %c0_321 = arith.constant 0 : index
    %c1_322 = arith.constant 1 : index
    %c0_323 = arith.constant 0 : index
    %218 = vector.load %arg1[%c10_320, %c0_321, %c1_322, %c0_323] : memref<17x2x9x4xf32, #tpu.memory_space<vmem>>, vector<1x1x8x4xf32>
    %219 = vector.shape_cast %218 : vector<1x1x8x4xf32> to vector<8x4xf32>
    %c12_324 = arith.constant 12 : index
    %c0_325 = arith.constant 0 : index
    %c1_326 = arith.constant 1 : index
    %c0_327 = arith.constant 0 : index
    %220 = vector.load %arg1[%c12_324, %c0_325, %c1_326, %c0_327] : memref<17x2x9x4xf32, #tpu.memory_space<vmem>>, vector<1x1x8x4xf32>
    %221 = vector.shape_cast %220 : vector<1x1x8x4xf32> to vector<8x4xf32>
    %c14_328 = arith.constant 14 : index
    %c0_329 = arith.constant 0 : index
    %c1_330 = arith.constant 1 : index
    %c0_331 = arith.constant 0 : index
    %222 = vector.load %arg1[%c14_328, %c0_329, %c1_330, %c0_331] : memref<17x2x9x4xf32, #tpu.memory_space<vmem>>, vector<1x1x8x4xf32>
    %223 = vector.shape_cast %222 : vector<1x1x8x4xf32> to vector<8x4xf32>
    %c16_332 = arith.constant 16 : index
    %c0_333 = arith.constant 0 : index
    %c1_334 = arith.constant 1 : index
    %c0_335 = arith.constant 0 : index
    %224 = vector.load %arg1[%c16_332, %c0_333, %c1_334, %c0_335] : memref<17x2x9x4xf32, #tpu.memory_space<vmem>>, vector<1x1x8x4xf32>
    %225 = vector.shape_cast %224 : vector<1x1x8x4xf32> to vector<8x4xf32>
    %226 = tpu.concatenate %211, %213, %215, %217, %219, %221, %223, %225 in 0 : vector<8x4xf32>, vector<8x4xf32>, vector<8x4xf32>, vector<8x4xf32>, vector<8x4xf32>, vector<8x4xf32>, vector<8x4xf32>, vector<8x4xf32> -> vector<64x4xf32>
    %227 = arith.truncf %226 : vector<64x4xf32> to vector<64x4xbf16>
    %c8_336 = arith.constant 8 : index
    %c0_337 = arith.constant 0 : index
    %c0_338 = arith.constant 0 : index
    %228 = vector.load %arg2[%c8_336, %c0_337, %c0_338] : memref<9x4x128xbf16, #tpu.memory_space<vmem>>, vector<1x4x128xbf16>
    %229 = vector.shape_cast %228 : vector<1x4x128xbf16> to vector<4x128xbf16>
    %cst_339 = arith.constant dense<0.000000e+00> : vector<64x128xf32>
    %230 = tpu.matmul %227, %229, %cst_339 {dimension_numbers = #tpu.dot_dimension_numbers<[1], [0], [0], [1], [0, 0, 1, 1], [], []>} : vector<64x4xbf16>, vector<4x128xbf16>, vector<64x128xf32> -> vector<64x128xf32>
    %231 = arith.addf %205, %230 : vector<64x128xf32>
    %c8_340 = arith.constant 8 : index
    %c0_341 = arith.constant 0 : index
    %c0_342 = arith.constant 0 : index
    %232 = vector.load %arg4[%c8_340, %c0_341, %c0_342] : memref<9x4x128xbf16, #tpu.memory_space<vmem>>, vector<1x4x128xbf16>
    %233 = vector.shape_cast %232 : vector<1x4x128xbf16> to vector<4x128xbf16>
    %cst_343 = arith.constant dense<0.000000e+00> : vector<64x128xf32>
    %234 = tpu.matmul %227, %233, %cst_343 {dimension_numbers = #tpu.dot_dimension_numbers<[1], [0], [0], [1], [0, 0, 1, 1], [], []>} : vector<64x4xbf16>, vector<4x128xbf16>, vector<64x128xf32> -> vector<64x128xf32>
    %235 = arith.addf %209, %234 : vector<64x128xf32>
    %c0_344 = arith.constant 0 : index
    %c0_345 = arith.constant 0 : index
    %236 = vector.load %arg5[%c0_344, %c0_345] : memref<1x128xf32, #tpu.memory_space<vmem>>, vector<1x128xf32>
    %237 = vector.broadcast %236 : vector<1x128xf32> to vector<64x128xf32>
    %238 = arith.mulf %231, %237 : vector<64x128xf32>
    %c0_346 = arith.constant 0 : index
    %c0_347 = arith.constant 0 : index
    %239 = vector.load %arg6[%c0_346, %c0_347] : memref<1x128xf32, #tpu.memory_space<vmem>>, vector<1x128xf32>
    %240 = vector.broadcast %239 : vector<1x128xf32> to vector<64x128xf32>
    %241 = arith.addf %238, %240 : vector<64x128xf32>
    %cst_348 = arith.constant 0.000000e+00 : f32
    %242 = vector.broadcast %cst_348 : f32 to vector<64x128xf32>
    %243 = arith.maximumf %241, %242 : vector<64x128xf32>
    %244 = arith.truncf %243 : vector<64x128xf32> to vector<64x128xbf16>
    %c0_349 = arith.constant 0 : index
    %c0_350 = arith.constant 0 : index
    %245 = vector.load %arg3[%c0_349, %c0_350] : memref<128x128xbf16, #tpu.memory_space<vmem>>, vector<128x128xbf16>
    %cst_351 = arith.constant dense<0.000000e+00> : vector<64x128xf32>
    %246 = tpu.matmul %244, %245, %cst_351 {dimension_numbers = #tpu.dot_dimension_numbers<[1], [0], [0], [1], [0, 0, 1, 1], [], []>} : vector<64x128xbf16>, vector<128x128xbf16>, vector<64x128xf32> -> vector<64x128xf32>
    %c0_352 = arith.constant 0 : index
    %c0_353 = arith.constant 0 : index
    %247 = vector.load %arg7[%c0_352, %c0_353] : memref<1x128xf32, #tpu.memory_space<vmem>>, vector<1x128xf32>
    %248 = vector.broadcast %247 : vector<1x128xf32> to vector<64x128xf32>
    %249 = arith.mulf %246, %248 : vector<64x128xf32>
    %c0_354 = arith.constant 0 : index
    %c0_355 = arith.constant 0 : index
    %250 = vector.load %arg8[%c0_354, %c0_355] : memref<1x128xf32, #tpu.memory_space<vmem>>, vector<1x128xf32>
    %251 = vector.broadcast %250 : vector<1x128xf32> to vector<64x128xf32>
    %252 = arith.addf %249, %251 : vector<64x128xf32>
    %cst_356 = arith.constant 0.000000e+00 : f32
    %253 = vector.broadcast %cst_356 : f32 to vector<64x128xf32>
    %254 = arith.maximumf %252, %253 : vector<64x128xf32>
    %c0_357 = arith.constant 0 : index
    %c0_358 = arith.constant 0 : index
    %255 = vector.load %arg11[%c0_357, %c0_358] : memref<64x128xf32, #tpu.memory_space<vmem>>, vector<64x128xf32>
    tpu.vector_store %arg11[%c0_357, %c0_358], %254 {strides = array<i32>} : memref<64x128xf32, #tpu.memory_space<vmem>>, vector<64x128xf32>,
    %c0_359 = arith.constant 0 : index
    %c0_360 = arith.constant 0 : index
    %256 = vector.load %arg9[%c0_359, %c0_360] : memref<1x128xf32, #tpu.memory_space<vmem>>, vector<1x128xf32>
    %257 = vector.broadcast %256 : vector<1x128xf32> to vector<64x128xf32>
    %258 = arith.mulf %235, %257 : vector<64x128xf32>
    %c0_361 = arith.constant 0 : index
    %c0_362 = arith.constant 0 : index
    %259 = vector.load %arg10[%c0_361, %c0_362] : memref<1x128xf32, #tpu.memory_space<vmem>>, vector<1x128xf32>
    %260 = vector.broadcast %259 : vector<1x128xf32> to vector<64x128xf32>
    %261 = arith.addf %258, %260 : vector<64x128xf32>
    %c0_363 = arith.constant 0 : index
    %c0_364 = arith.constant 0 : index
    %262 = vector.load %arg12[%c0_363, %c0_364] : memref<64x128xf32, #tpu.memory_space<vmem>>, vector<64x128xf32>
    tpu.vector_store %arg12[%c0_363, %c0_364], %261 {strides = array<i32>} : memref<64x128xf32, #tpu.memory_space<vmem>>, vector<64x128xf32>,
    return
  }
  func.func @transform_0(%arg0: i32) -> (i32, i32, i32, i32) {
    %c0_i32 = arith.constant 0 : i32
    %c0_i32_0 = arith.constant 0 : i32
    %c0_i32_1 = arith.constant 0 : i32
    %c0_i32_2 = arith.constant 0 : i32
    return %arg0, %c0_i32, %c0_i32_0, %c0_i32_1 : i32, i32, i32, i32
  }
  func.func @transform_1(%arg0: i32) -> (i32, i32, i32) {
    %c0_i32 = arith.constant 0 : i32
    %c0_i32_0 = arith.constant 0 : i32
    %c0_i32_1 = arith.constant 0 : i32
    %c0_i32_2 = arith.constant 0 : i32
    return %c0_i32, %c0_i32_0, %c0_i32_1 : i32, i32, i32
  }
  func.func @transform_2(%arg0: i32) -> (i32, i32) {
    %c0_i32 = arith.constant 0 : i32
    %c0_i32_0 = arith.constant 0 : i32
    %c0_i32_1 = arith.constant 0 : i32
    return %c0_i32, %c0_i32_0 : i32, i32
  }
  func.func @transform_3(%arg0: i32) -> (i32, i32, i32) {
    %c0_i32 = arith.constant 0 : i32
    %c0_i32_0 = arith.constant 0 : i32
    %c0_i32_1 = arith.constant 0 : i32
    %c0_i32_2 = arith.constant 0 : i32
    return %c0_i32, %c0_i32_0, %c0_i32_1 : i32, i32, i32
  }
  func.func @transform_4(%arg0: i32) -> (i32, i32) {
    %c0_i32 = arith.constant 0 : i32
    %c0_i32_0 = arith.constant 0 : i32
    %c0_i32_1 = arith.constant 0 : i32
    return %c0_i32, %c0_i32_0 : i32, i32
  }
  func.func @transform_5(%arg0: i32) -> (i32, i32) {
    %c0_i32 = arith.constant 0 : i32
    %c0_i32_0 = arith.constant 0 : i32
    %c0_i32_1 = arith.constant 0 : i32
    return %c0_i32, %c0_i32_0 : i32, i32
  }
  func.func @transform_6(%arg0: i32) -> (i32, i32) {
    %c0_i32 = arith.constant 0 : i32
    %c0_i32_0 = arith.constant 0 : i32
    %c0_i32_1 = arith.constant 0 : i32
    return %c0_i32, %c0_i32_0 : i32, i32
  }
  func.func @transform_7(%arg0: i32) -> (i32, i32) {
    %c0_i32 = arith.constant 0 : i32
    %c0_i32_0 = arith.constant 0 : i32
    %c0_i32_1 = arith.constant 0 : i32
    return %c0_i32, %c0_i32_0 : i32, i32
  }
  func.func @transform_8(%arg0: i32) -> (i32, i32) {
    %c0_i32 = arith.constant 0 : i32
    %c0_i32_0 = arith.constant 0 : i32
    %c0_i32_1 = arith.constant 0 : i32
    return %c0_i32, %c0_i32_0 : i32, i32
  }
  func.func @transform_9(%arg0: i32) -> (i32, i32) {
    %c0_i32 = arith.constant 0 : i32
    %c0_i32_0 = arith.constant 0 : i32
    %c0_i32_1 = arith.constant 0 : i32
    return %c0_i32, %c0_i32_0 : i32, i32
  }
  func.func @transform_10(%arg0: i32) -> (i32, i32) {
    %c0_i32 = arith.constant 0 : i32
    %c0_i32_0 = arith.constant 0 : i32
    return %arg0, %c0_i32 : i32, i32
  }
  func.func @transform_11(%arg0: i32) -> (i32, i32) {
    %c0_i32 = arith.constant 0 : i32
    %c0_i32_0 = arith.constant 0 : i32
    return %arg0, %c0_i32 : i32, i32
  }
}

</mosaic_0001>

<bundles_post_ra>
// kernel: tpu_custom_call.1
= control target key start
LH: loop header
LB: loop body
LE: loop exit
PB: predicated region body
PF: predicated region fallthrough
CT: control target
= control target key end

     0   :  { %s2803_s0 = inlined_call_operand.vmem [shape: f32[34,2,9,4], index: 0, kind: input, shape index: {}]   ;;  %s2804_s1 = inlined_call_operand.vmem [shape: bf16[9,4,128], index: 1, kind: input, shape index: {}]   ;;  %s2805_s2 = inlined_call_operand.vmem [shape: bf16[128,128], index: 2, kind: input, shape index: {}]   ;;  %s2806_s3 = inlined_call_operand.vmem [shape: bf16[9,4,128], index: 3, kind: input, shape index: {}]   ;;  %s2807_s4 = inlined_call_operand.vmem [shape: f32[1,128], index: 4, kind: input, shape index: {}]   ;;  %s2808_s5 = inlined_call_operand.vmem [shape: f32[1,128], index: 5, kind: input, shape index: {}]   ;;  %s2809_s6 = inlined_call_operand.vmem [shape: f32[1,128], index: 6, kind: input, shape index: {}]   ;;  %s2810_s7 = inlined_call_operand.vmem [shape: f32[1,128], index: 7, kind: input, shape index: {}]   ;;  %s2811_s8 = inlined_call_operand.vmem [shape: f32[1,128], index: 8, kind: input, shape index: {}]   ;;  %s2812_s9 = inlined_call_operand.vmem [shape: f32[1,128], index: 9, kind: input, shape index: {}]   ;;  %s2813_s10 = inlined_call_operand.hbm [shape: f32[128,128], index: 10, kind: output, shape index: {0}]   ;;  %s2814_s11 = inlined_call_operand.hbm [shape: f32[128,128], index: 11, kind: output, shape index: {1}]  }
   0x1   :  { %2816 = sst [smem:[#allocation8_spill]] %s2803_s0 }
   0x2   :  { %2817 = sst [smem:[#allocation9_spill]] %s2804_s1 }
   0x3   :  { %2818 = sst [smem:[#allocation10_spill]] %s2805_s2 }
   0x4   :  { %2819 = sst [smem:[#allocation11_spill]] %s2806_s3 }
   0x5   :  { %2820 = sst [smem:[#allocation12_spill]] %s2807_s4 }
   0x6   :  { %2821 = sst [smem:[#allocation13_spill]] %s2808_s5 }
   0x7   :  { %17 = vsyncpa [#allocation3], 0 }
   0x8   :  { %19 = vsyncpa [#allocation3 + $0x1], 0 }
   0x9   :  { %20 = vsyncpa [#allocation5], 0 }
   0xa   :  { %22 = vsyncpa [#allocation5 + $0x1], 0  ;;  %s2099_s17 = smov 0   ;;  %s2101_s18 = smov 0  }
   0xb   :  { %s2103_s19 = smov 0   ;;  %s2105_s20 = smov 0  }
   0xc LB: > { %s2120_s21 = sadd.s32 4294967295, %s2035_s20   ;;  %s1690_s22 = sadd.s32 4294967294, %s2035_s20   ;;  %s2035_s20 = sphi %s2105_s20, %s2834_s20   ;;  %s2031_s19 = sphi %s2103_s19, %s2833_s19   ;;  %s2027_s18 = sphi %s2101_s18, %s2832_s18   ;;  %s2023_s17 = sphi %s2099_s17, %s2831_s17  }
   0xd   : > { %s2124_s23 = sadd.s32 1, %s2035_s20   ;;  %s250_s24 = sadd.s32 1, %s2031_s19 }
   0xe   : > { %s247_s25 = ssub.s32 %s2035_s20, %s2124_s23  ;;  %p260_p0 = scmp.ne.s32.totalorder %s2031_s19, %s2027_s18 }
   0xf   : > { %p248_p1 = scmp.eq.s32.totalorder %s247_s25, 0  ;;  %p261_p2 = scmp.eq.s32.totalorder %s2120_s21, 1 }
  0x10   : > { %p266_p3 = scmp.ne.s32.totalorder %s2027_s18, %s2023_s17  ;;  %p267_p4 = scmp.eq.s32.totalorder %s1690_s22, 1 }
  0x11   : > { %s2135_s26 = scalar_select %p248_p1, %s2031_s19, %s250_s24  }
  0x12   : > { %p2137_p5 = por %p261_p2, %p260_p0  ;;  %p2141_p6 = por %p267_p4, %p266_p3 }
  0x13   : > { %p1693_p7 = scmp.ge.s32.totalorder %s2035_s20, 1  ;;  %p348_p8 = scmp.lt.s32.totalorder %s2035_s20, 3 }
  0x15   : > { %p349_p9 = pnand %p1693_p7, %p348_p8 }
  0x16   : > { %s2824_s1 = sld [smem:[#allocation9_spill]] (!%p349_p9)  ;;  %s394_s14 = smul.u32 (!%p349_p9), 17, %s2120_s21 }
  0x17   : > { %352 = sbr.rel (%p349_p9) target bundleno = 617 (0x269), region = 60  ;;  %s2825_s3 = sld [smem:[#allocation11_spill]] (!%p349_p9) }
  0x18   : > { %p395_p10 = scmp.lt.s32.totalorder (!%p349_p9), %s394_s14, 33  ;;  %s2826_s0 = sld [smem:[#allocation8_spill]] (!%p349_p9) }
  0x19   : > { %s2827_s2 = sld [smem:[#allocation10_spill]] (!%p349_p9)  ;;  %s1884_s30 = sshll.u32 (!%p349_p9), %s2120_s21, 6 }
  0x1a   : > { %s2828_s4 = sld [smem:[#allocation12_spill]] (!%p349_p9)  ;;  %s1591_s15 = scalar_lea.hbm (!%p349_p9), %s2814_s11, %s1884_s30 }
  0x1b   : > { %s2829_s5 = sld [smem:[#allocation13_spill]] (!%p349_p9) }
  0x1c   : > { %v1713_v0 = vld [vmem:[%s2824_s1 + $0x2] sm:$0x3]  ;;  %vm460_vm0 = vcmask 1041408   ;;  %v423_v4 = vld [vmem:[%s2824_s1] sm:$0x3]  ;;  %s2836_s14 = smov (!%p395_p10, %s394_s14), 33 }
  0x1d   : > { %v1722_v1 = vld [vmem:[%s2825_s3 + $0x2] sm:$0x3]  ;;  %v462_v2 = vsel %vm460_vm0, %v1713_v0, 0  ;;  %v506_v5 = vsel %vm460_vm0, %v423_v4, 0  ;;  %s1875_s22 = sshll.u32 %s2836_s14, 5  ;;  %vm447_vm1 = vcmask 31744  }
  0x1e   : > { %v540_v3 = vsel %vm460_vm0, %v1722_v1, 0  ;;  %471 = vmatpush.bf16.msra.mxu0 %v462_v2  ;;  %1886 = vmatpush.bf16.msra.mxu3 %v462_v2  ;;  %s2163_s29 = scalar_lea.vmem %s2826_s0, %s1875_s22  ;;  %v424_v28 = vld [vmem:[%s2825_s3] sm:$0x3]  ;;  %v1756_v29 = vld [vmem:[%s2824_s1 + $0x6] sm:$0x3]  ;;  %s2639_s14 = sand.u32 1, %s2027_s18  }
  0x1f   : > { %1888 = vmatpush.bf16.msra.mxu2 %v540_v3  ;;  %1887 = vmatpush.bf16.msra.mxu1 %v506_v5  ;;  %v1705_v6 = vld [vmem:[%s2163_s29 + $0x10] sm:$0xff]  ;;  %v1698_v12 = vld [vmem:[%s2163_s29 + $0x40] sm:$0xff]  ;;  %v572_v30 = vsel %vm460_vm0, %v424_v28, 0  ;;  %v746_v31 = vsel %vm460_vm0, %v1756_v29, 0  ;;  %v1774_v42 = vld [vmem:[%s2824_s1 + $0x8] sm:$0x3] }
  0x20   : > { %v1706_v7 = vld [vmem:[%s2163_s29 + $0x50] sm:$0xff]  ;;  %v1699_v13 = vld [vmem:[%s2163_s29 + $0x80] sm:$0xff]  ;;  %v862_v45 = vsel %vm460_vm0, %v1774_v42, 0  ;;  %v1792_v0 = vld [vmem:[%s2824_s1 + $0xa] sm:$0x3]  ;;  %s2815_s16 = sshll.u32 %s2639_s14, 6 }
  0x21   : > { %v1707_v8 = vld [vmem:[%s2163_s29 + $0x90] sm:$0xff]  ;;  %v441_v9 = vpack.c.bf16 %v1706_v7, %v1705_v6  ;;  %v1700_v15 = vld [vmem:[%s2163_s29 + $0xc0] sm:$0xff]  ;;  %v2174_v16 = vpack.c.bf16 %v1699_v13, %v1698_v12  ;;  %v970_v2 = vsel %vm460_vm0, %v1792_v0, 0  ;;  %s2661_s25 = scalar_lea.vmem [#allocation4], %s2815_s16  ;;  %s1594_s22 = sshll.u32 %s1591_s15, 4  ;;  %s1595_s22 = int_to_ptr.hbm [resolvable:$true] %s1594_s22 }
  0x22   : > { %515 = vmatpush.bf16.msrb.mxu0 %v506_v5  ;;  %v1708_v10 = vld [vmem:[%s2163_s29 + $0xd0] sm:$0xff]  ;;  %v2169_v11 = vpack.c.bf16 %v1707_v8, %v1706_v7  ;;  %v2178_v18 = vpack.c.bf16 %v1700_v15, %v1699_v13  ;;  %v1701_v20 = vld [vmem:[%s2163_s29 + $0x100] sm:$0xff]  ;;  %581 = vmatpush.bf16.msrb.mxu3 %v572_v30  ;;  %s1563_s24 = scalar_lea.sflag [#allocation5], %s2639_s14  ;;  %s1955_s16 = sshra.s32 %s1595_s22, 4  ;;  %s1956_s16 = int_to_ptr.hbm [resolvable:$true] %s1955_s16 }
  0x23   : > { %v442_v14 = vpack.c.bf16 %v1708_v10, %v1707_v8  ;;  %v1709_v17 = vld [vmem:[%s2163_s29 + $0x110] sm:$0xff]  ;;  %1714 = vmatmul.msk.bf16.vlgmr.msra.gmra.mxu0 %vm447_vm1, %v441_v9  ;;  %v2186_v22 = vpack.c.bf16 %v1701_v20, %v1700_v15  ;;  %v1702_v24 = vld [vmem:[%s2163_s29 + $0x140] sm:$0xff]  ;;  %755 = vmatpush.bf16.msrb.mxu2 %v746_v31  ;;  %v1803_v8 = vld [vmem:[%s2824_s1 + $0xc] sm:$0x3]  ;;  %s1957_s0 = scalar_lea.hbm %s1956_s16, 64  ;;  %p1962_p0 = scmp.lt.s32.totalorder %s1956_s16, %s2814_s11 }
  0x24   : > { %v2180_v19 = vpack.c.bf16 %v1709_v17, %v1708_v10  ;;  %v1710_v21 = vld [vmem:[%s2163_s29 + $0x150] sm:$0xff]  ;;  %1719 = vmatmul.msk.bf16.vlgmr.msra.gmra.mxu1 %vm447_vm1, %v2178_v18  ;;  %v1703_v26 = vld [vmem:[%s2163_s29 + $0x180] sm:$0xff]  ;;  %v421_v36 = vpack.c.bf16 %v1702_v24, %v1701_v20  ;;  %v1072_v10 = vsel %vm460_vm0, %v1803_v8, 0  ;;  %p1958_p11 = scmp.ne.s32.totalorder %s1956_s16, %s1957_s0 }
  0x25   : > { %1715 = vmatmul.msk.bf16.vlgmr.msra.gmra.mxu3 %vm447_vm1, %v442_v14  ;;  %1724 = vmatmul.msk.bf16.vlgmr.msra.gmra.mxu2 %vm447_vm1, %v442_v14  ;;  %v1711_v23 = vld [vmem:[%s2163_s29 + $0x190] sm:$0xff]  ;;  %v2195_v27 = vpack.c.bf16 %v1703_v26, %v1702_v24  ;;  %v404_v32 = vld [vmem:[%s2163_s29] sm:$0xff]  ;;  %v443_v35 = vpack.c.bf16 %v1710_v21, %v1709_v17 }
  0x26   : > { %549 = vmatpush.bf16.msra.mxu0 %v540_v3  ;;  %v2192_v25 = vpack.c.bf16 %v1711_v23, %v1710_v21  ;;  %v419_v33 = vpack.c.bf16 %v1698_v12, %v404_v32  ;;  %v1738_v34 = vld [vmem:[%s2824_s1 + $0x4] sm:$0x3]  ;;  %v2219_v40 = vld [vmem:[%s2163_s29 + $0x1d0] sm:$0xff]  ;;  %v1761_v1 = vld [vmem:[%s2825_s3 + $0x6] sm:$0x3]  ;;  %p1959_p12 = pnand %p1958_p11, %p2137_p5 }
  0x27   : > { %v630_v37 = vsel %vm460_vm0, %v1738_v34, 0  ;;  %v1743_v38 = vld [vmem:[%s2825_s3 + $0x4] sm:$0x3]  ;;  %v444_v43 = vpack.c.bf16 %v2219_v40, %v1711_v23  ;;  %v788_v3 = vsel %vm460_vm0, %v1761_v1, 0  ;;  %979 = vmatpush.bf16.msra.mxu2 %v970_v2  ;;  %v1766_v20 = vld [vmem:[%s2163_s29 + $0x30] sm:$0xff] }
  0x28   : > { %v672_v39 = vsel %vm460_vm0, %v1743_v38, 0  ;;  %v2222_v41 = vld [vmem:[%s2163_s29 + $0x1c0] sm:$0xff]  ;;  %797 = vmatpush.bf16.msra.mxu3 %v788_v3  ;;  %v1767_v21 = vld [vmem:[%s2163_s29 + $0x70] sm:$0xff]  ;;  %v1808_v3 = vld [vmem:[%s2825_s3 + $0xc] sm:$0x3]  ;;  %p1960_p13 = pneg %p1959_p12 }
  0x29   : > { %681 = vmatpush.bf16.msrb.mxu1 %v672_v39  ;;  %v422_v44 = vpack.c.bf16 %v2222_v41, %v1703_v26  ;;  %v1731_v46 = vld [vmem:[%s2163_s29 + $0x41] sm:$0xff]  ;;  %v843_v26 = vpack.c.bf16 %v1767_v21, %v1766_v20  ;;  %v1768_v29 = vld [vmem:[%s2163_s29 + $0xb0] sm:$0xff] }
  0x2a   : > { %v1732_v47 = vld [vmem:[%s2163_s29 + $0x81] sm:$0xff]  ;;  %v1769_v30 = vld [vmem:[%s2163_s29 + $0xf0] sm:$0xff] }
  0x2b   : > { %v2235_v48 = vpack.c.bf16 %v1732_v47, %v1731_v46  ;;  %v603_v49 = vld [vmem:[%s2163_s29 + $0x1] sm:$0xff] }
  0x2c   : > { %v1748_v50 = vld [vmem:[%s2163_s29 + $0x20] sm:$0xff]  ;;  %v611_v52 = vpack.c.bf16 %v1731_v46, %v603_v49  ;;  %v1770_v46 = vld [vmem:[%s2163_s29 + $0x130] sm:$0xff] }
  0x2d   : > { %v1749_v51 = vld [vmem:[%s2163_s29 + $0x60] sm:$0xff] }
  0x2e   : > { %v727_v53 = vpack.c.bf16 %v1749_v51, %v1748_v50  ;;  %v1733_v54 = vld [vmem:[%s2163_s29 + $0xc1] sm:$0xff] }
  0x2f   : > { %v1734_v55 = vld [vmem:[%s2163_s29 + $0x101] sm:$0xff]  ;;  %v612_v59 = vpack.c.bf16 %v1733_v54, %v1732_v47  ;;  %v1771_v47 = vld [vmem:[%s2163_s29 + $0x170] sm:$0xff] }
  0x30   : > { %v2246_v56 = vpack.c.bf16 %v1734_v55, %v1733_v54  ;;  %v1750_v57 = vld [vmem:[%s2163_s29 + $0xa0] sm:$0xff]  ;;  %v1797_v54 = vld [vmem:[%s2825_s3 + $0xa] sm:$0x3] }
  0x31   : > { %v1751_v58 = vld [vmem:[%s2163_s29 + $0xe0] sm:$0xff] }
  0x32   : > { %v728_v60 = vpack.c.bf16 %v1751_v58, %v1750_v57  ;;  %v1735_v61 = vld [vmem:[%s2163_s29 + $0x141] sm:$0xff] }
  0x33   : > { %1718 = vmatmul.msk.bf16.vlgmr.msrb.gmra.mxu0 %vm447_vm1, %v419_v33  ;;  %v1736_v62 = vld [vmem:[%s2163_s29 + $0x181] sm:$0xff]  ;;  %v613_v6 = vpack.c.bf16 %v1735_v61, %v1734_v55 }
  0x34   : > { %1720 = vmatmul.msk.bf16.gmra.mxu1 %vm447_vm1, %v421_v36  ;;  %639 = vmatpush.bf16.msrb.mxu0 %v630_v37  ;;  %v2257_v63 = vpack.c.bf16 %v1736_v62, %v1735_v61  ;;  %v1752_v4 = vld [vmem:[%s2163_s29 + $0x120] sm:$0xff] }
  0x35   : > { %1716 = vmatmul.msk.bf16.gmra.mxu3 %vm447_vm1, %v443_v35  ;;  %1725 = vmatmul.msk.bf16.gmra.mxu2 %vm447_vm1, %v443_v35  ;;  %v1753_v5 = vld [vmem:[%s2163_s29 + $0x160] sm:$0xff] }
  0x36   : > { %v2270_v7 = vpack.c.bf16 %v1753_v5, %v1752_v4  ;;  %v2286_v13 = vld [vmem:[%s2163_s29 + $0x1c1] sm:$0xff] }
  0x37   : > { %v1754_v14 = vld [vmem:[%s2163_s29 + $0x1a0] sm:$0xff]  ;;  %v614_v17 = vpack.c.bf16 %v2286_v13, %v1736_v62  ;;  %v1825_v62 = vld [vmem:[%s2824_s1 + $0x10] sm:$0x3] }
  0x38   : > { %v1755_v15 = vld [vmem:[%s2163_s29 + $0x1e0] sm:$0xff]  ;;  %v1275_v0 = vsel %vm460_vm0, %v1825_v62, 0 }
  0x39   : > { %v1784_v23 = vld [vmem:[%s2163_s29 + $0x21] sm:$0xff] }
  0x3a   : > { %v1785_v24 = vld [vmem:[%s2163_s29 + $0x61] sm:$0xff] }
  0x3b   : > { %v2302_v28 = vpack.c.bf16 %v1785_v24, %v1784_v23  ;;  %v1786_v31 = vld [vmem:[%s2163_s29 + $0xa1] sm:$0xff] }
  0x3c   : > { %v1787_v32 = vld [vmem:[%s2163_s29 + $0xe1] sm:$0xff] }
  0x3d   : > { %v2313_v35 = vpack.c.bf16 %v1787_v32, %v1786_v31  ;;  %v1788_v49 = vld [vmem:[%s2163_s29 + $0x121] sm:$0xff] }
  0x3e   : > { %v1789_v50 = vld [vmem:[%s2163_s29 + $0x161] sm:$0xff] }
  0x3f   : > { %v2339_v58 = vpack.c.bf16 %v1789_v50, %v1788_v49 }
  0x43   : > { %1723 = vmatmul.msk.bf16.vlgmr.msra.gmra.mxu0 %vm447_vm1, %v441_v9  ;;  %v1779_v9 = vld [vmem:[%s2825_s3 + $0x8] sm:$0x3] }
  0x44   : > { %1721 = vmatmul.msk.bf16.gmra.mxu1 %vm447_vm1, %v422_v44  ;;  %871 = vmatpush.bf16.msra.mxu0 %v862_v45  ;;  %v904_v12 = vsel %vm460_vm0, %v1779_v9, 0  ;;  %v1772_v9 = vld [vmem:[%s2163_s29 + $0x1b0] sm:$0xff] }
  0x45   : > { %1717 = vmatmul.msk.bf16.gmra.mxu3 %vm447_vm1, %v444_v43  ;;  %1726 = vmatmul.msk.bf16.gmra.mxu2 %vm447_vm1, %v444_v43  ;;  %v1814_v43 = vld [vmem:[%s2824_s1 + $0xe] sm:$0x3] }
  0x46   : > { %913 = vmatpush.bf16.msra.mxu1 %v904_v12  ;;  %v1790_v12 = vld [vmem:[%s2163_s29 + $0x1a1] sm:$0xff] }
  0x53   : > { %1739 = vmatmul.msk.bf16.vlgmr.msrb.gmra.mxu0 %vm447_vm1, %v611_v52 }
  0x54   : > { %1744 = vmatmul.msk.bf16.vlgmr.msrb.gmra.mxu1 %vm447_vm1, %v611_v52  ;;  %1081 = vmatpush.bf16.msrb.mxu0 %v1072_v10  ;;  %v1773_v10 = vld [vmem:[%s2163_s29 + $0x1f0] sm:$0xff] }
  0x55   : > { %1727 = vmatmul.msk.bf16.vlgmr.msrb.gmra.mxu3 %vm447_vm1, %v419_v33  ;;  %1757 = vmatmul.msk.bf16.vlgmr.msrb.gmra.mxu2 %vm447_vm1, %v727_v53  ;;  %v844_v33 = vpack.c.bf16 %v1769_v30, %v1768_v29  ;;  %v846_v20 = vpack.c.bf16 %v1773_v10, %v1772_v9 }
  0x63   : > { %1740 = vmatmul.msk.bf16.gmra.mxu0 %vm447_vm1, %v612_v59 }
  0x64   : > { %1745 = vmatmul.msk.bf16.gmra.mxu1 %vm447_vm1, %v612_v59  ;;  %v1012_v59 = vsel %vm460_vm0, %v1797_v54, 0 }
  0x65   : > { %1728 = vmatmul.msk.bf16.gmra.mxu3 %vm447_vm1, %v2178_v18  ;;  %1758 = vmatmul.msk.bf16.gmra.mxu2 %vm447_vm1, %v728_v60  ;;  %v2291_v18 = vpack.c.bf16 %v1755_v15, %v1754_v14  ;;  %v1791_v14 = vld [vmem:[%s2163_s29 + $0x1e1] sm:$0xff] }
  0x66   : > { %1021 = vmatpush.bf16.msrb.mxu3 %v1012_v59  ;;  %v2368_v24 = vpack.c.bf16 %v1791_v14, %v1790_v12 }
  0x73   : > { %1741 = vmatmul.msk.bf16.gmra.mxu0 %vm447_vm1, %v613_v6 }
  0x74   : > { %1746 = vmatmul.msk.bf16.gmra.mxu1 %vm447_vm1, %v613_v6  ;;  %v1114_v6 = vsel %vm460_vm0, %v1808_v3, 0 }
  0x75   : > { %1729 = vmatmul.msk.bf16.gmra.mxu3 %vm447_vm1, %v421_v36  ;;  %1759 = vmatmul.msk.bf16.gmra.mxu2 %vm447_vm1, %v2270_v7 }
  0x76   : > { %1123 = vmatpush.bf16.msrb.mxu1 %v1114_v6 }
  0x83   : > { %1742 = vmatmul.msk.bf16.gmra.mxu0 %vm447_vm1, %v614_v17 }
  0x84   : > { %1747 = vmatmul.msk.bf16.gmra.mxu1 %vm447_vm1, %v614_v17 }
  0x85   : > { %1730 = vmatmul.msk.bf16.gmra.mxu3 %vm447_vm1, %v422_v44  ;;  %1760 = vmatmul.msk.bf16.gmra.mxu2 %vm447_vm1, %v2291_v18  ;;  %v1174_v44 = vsel %vm460_vm0, %v1814_v43, 0 }
  0x86   : > { %1183 = vmatpush.bf16.msrb.mxu2 %v1174_v44 }
  0x93   : > { %1775 = vmatmul.msk.bf16.vlgmr.msra.gmra.mxu0 %vm447_vm1, %v843_v26 }
  0x94   : > { %1780 = vmatmul.msk.bf16.vlgmr.msra.gmra.mxu1 %vm447_vm1, %v843_v26  ;;  %1284 = vmatpush.bf16.msra.mxu0 %v1275_v0 }
  0x95   : > { %1762 = vmatmul.msk.bf16.vlgmr.msra.gmra.mxu3 %vm447_vm1, %v727_v53  ;;  %1793 = vmatmul.msk.bf16.vlgmr.msra.gmra.mxu2 %vm447_vm1, %v2302_v28  ;;  %v845_v53 = vpack.c.bf16 %v1771_v47, %v1770_v46 }
  0xa0   : > { %v473_v34 = vpop.f32.mrf.mxu0 }
  0xa1   : > { %v522_v36 = vpop.f32.mrf.mxu1 }
  0xa3   : > { %1776 = vmatmul.msk.bf16.gmra.mxu0 %vm447_vm1, %v844_v33 }
  0xa4   : > { %1781 = vmatmul.msk.bf16.gmra.mxu1 %vm447_vm1, %v844_v33 }
  0xa5   : > { %1763 = vmatmul.msk.bf16.gmra.mxu3 %vm447_vm1, %v728_v60  ;;  %1794 = vmatmul.msk.bf16.gmra.mxu2 %vm447_vm1, %v2313_v35 }
  0xa8   : > { %v478_v37 = vpop.f32.mrf.mxu3  ;;  %v2320_v38 = vpop.f32.mrf.mxu2 }
  0xa9   : > { %v475_v39 = vpop.f32.mrf.mxu0  ;;  %v2322_v42 = vadd.f32 %v522_v36, %v478_v37  ;;  %v524_v45 = vpop.f32.mrf.mxu1 }
  0xb0   : > { %v480_v51 = vpop.f32.mrf.mxu3  ;;  %v2332_v52 = vpop.f32.mrf.mxu2 }
  0xb1   : > { %v517_v55 = vpop.f32.mrf.mxu0  ;;  %v2337_v57 = vadd.f32 %v524_v45, %v480_v51  ;;  %v527_v61 = vpop.f32.mrf.mxu1 }
  0xb2   : > { %v518_v60 = vadd.f32 %v517_v55, %v473_v34 }
  0xb3   : > { %1777 = vmatmul.msk.bf16.gmra.mxu0 %vm447_vm1, %v845_v53 }
  0xb4   : > { %1782 = vmatmul.msk.bf16.gmra.mxu1 %vm447_vm1, %v845_v53 }
  0xb5   : > { %1764 = vmatmul.msk.bf16.gmra.mxu3 %vm447_vm1, %v2270_v7  ;;  %1795 = vmatmul.msk.bf16.gmra.mxu2 %vm447_vm1, %v2339_v58 }
  0xb8   : > { %v483_v1 = vpop.f32.mrf.mxu3  ;;  %v2352_v2 = vpop.f32.mrf.mxu2 }
  0xb9   : > { %v519_v4 = vpop.f32.mrf.mxu0  ;;  %v2357_v5 = vadd.f32 %v527_v61, %v483_v1  ;;  %v529_v8 = vpop.f32.mrf.mxu1 }
  0xba   : > { %v520_v7 = vadd.f32 %v519_v4, %v475_v39 }
  0xc0   : > { %v485_v15 = vpop.f32.mrf.mxu3  ;;  %v2364_v17 = vpop.f32.mrf.mxu2 }
  0xc1   : > { %v2366_v21 = vadd.f32 %v529_v8, %v485_v15  ;;  %v551_v23 = vpop.f32.mrf.mxu0  ;;  %v532_v26 = vpop.f32.mrf.mxu1  ;;  %v1830_v15 = vld [vmem:[%s2825_s3 + $0x10] sm:$0x3] }
  0xc3   : > { %1778 = vmatmul.msk.bf16.gmra.mxu0 %vm447_vm1, %v846_v20 }
  0xc4   : > { %1783 = vmatmul.msk.bf16.gmra.mxu1 %vm447_vm1, %v846_v20 }
  0xc5   : > { %1765 = vmatmul.msk.bf16.gmra.mxu3 %vm447_vm1, %v2291_v18  ;;  %1796 = vmatmul.msk.bf16.gmra.mxu2 %vm447_vm1, %v2368_v24 }
  0xc8   : > { %v488_v29 = vpop.f32.mrf.mxu3  ;;  %v2376_v30 = vpop.f32.mrf.mxu2 }
  0xc9   : > { %v2378_v31 = vadd.f32 %v532_v26, %v488_v29  ;;  %v553_v32 = vpop.f32.mrf.mxu0  ;;  %v534_v33 = vpop.f32.mrf.mxu1  ;;  %v1317_v29 = vsel %vm460_vm0, %v1830_v15, 0 }
  0xca   : > { %1326 = vmatpush.bf16.msra.mxu1 %v1317_v29 }
  0xd0   : > { %v490_v34 = vpop.f32.mrf.mxu3  ;;  %v2380_v36 = vpop.f32.mrf.mxu2 }
  0xd1   : > { %v2382_v37 = vadd.f32 %v534_v33, %v490_v34  ;;  %v641_v39 = vpop.f32.mrf.mxu0  ;;  %v683_v18 = vpop.f32.mrf.mxu1  ;;  %v1802_v33 = vld [vmem:[%s2163_s29 + $0x200] sm:$0xff]  ;;  %v1813_v34 = vld [vmem:[%s2163_s29 + $0x210] sm:$0xff] }
  0xd2   : > { %v661_v43 = vadd.f32 %v641_v39, %v518_v60  ;;  %v1056_v39 = vpack.c.bf16 %v1802_v33, %v2222_v41 }
  0xd3   : > { %1804 = vmatmul.msk.bf16.vlgmr.msrb.gmra.mxu0 %vm447_vm1, %v2174_v16 }
  0xd4   : > { %1809 = vmatmul.msk.bf16.vlgmr.msrb.gmra.mxu1 %vm447_vm1, %v2174_v16 }
  0xd5   : > { %1798 = vmatmul.msk.bf16.vlgmr.msrb.gmra.mxu3 %vm447_vm1, %v2302_v28  ;;  %1815 = vmatmul.msk.bf16.vlgmr.msrb.gmra.mxu2 %vm447_vm1, %v2169_v11 }
  0xd8   : > { %v583_v44 = vpop.f32.mrf.mxu3  ;;  %v757_v45 = vpop.f32.mrf.mxu2 }
  0xd9   : > { %v584_v46 = vadd.f32 %v583_v44, %v551_v23  ;;  %v2392_v47 = vadd.f32 %v757_v45, %v661_v43  ;;  %v643_v49 = vpop.f32.mrf.mxu0  ;;  %v685_v53 = vpop.f32.mrf.mxu1 }
  0xda   : > { %v2394_v50 = vadd.f32 %v643_v49, %v520_v7 }
  0xdb   : > { %v2396_v51 = vadd.f32 %v683_v18, %v584_v46 }
  0xe0   : > { %v585_v54 = vpop.f32.mrf.mxu3  ;;  %v2398_v55 = vpop.f32.mrf.mxu2 }
  0xe1   : > { %v586_v28 = vadd.f32 %v585_v54, %v553_v32  ;;  %v646_v59 = vpop.f32.mrf.mxu0  ;;  %v688_v16 = vpop.f32.mrf.mxu1 }
  0xe2   : > { %v663_v60 = vadd.f32 %v646_v59, %v2322_v42 }
  0xe3   : > { %v2401_v61 = vadd.f32 %v685_v53, %v586_v28  ;;  %1805 = vmatmul.msk.bf16.gmra.mxu0 %vm447_vm1, %v2186_v22 }
  0xe4   : > { %1810 = vmatmul.msk.bf16.gmra.mxu1 %vm447_vm1, %v2186_v22  ;;  %v1819_v22 = vld [vmem:[%s2825_s3 + $0xe] sm:$0x3]  ;;  %s1961_s3 = scalar_lea.hbm %s2814_s11, 128 }
  0xe5   : > { %1799 = vmatmul.msk.bf16.gmra.mxu3 %vm447_vm1, %v2313_v35  ;;  %1816 = vmatmul.msk.bf16.gmra.mxu2 %vm447_vm1, %v2180_v19  ;;  %p1963_p1 = scmp.lt.s32.totalorder %s1961_s3, %s1957_s0 }
  0xe7   : > { %p1964_p2 = por %p1963_p1, %p1962_p0 }
  0xe8   : > { %v588_v62 = vpop.f32.mrf.mxu3  ;;  %v762_v0 = vpop.f32.mrf.mxu2 }
  0xe9   : > { %v589_v1 = vadd.f32 %v588_v62, %v2320_v38  ;;  %v2412_v42 = vadd.f32 %v762_v0, %v663_v60  ;;  %v648_v3 = vpop.f32.mrf.mxu0  ;;  %v690_v7 = vpop.f32.mrf.mxu1  ;;  %v1216_v38 = vsel %vm460_vm0, %v1819_v22, 0  ;;  %p1965_p3 = pnand %p1964_p2, %p1960_p13 }
  0xea   : > { %v2415_v4 = vadd.f32 %v648_v3, %v2337_v57  ;;  %1225 = vmatpush.bf16.msra.mxu3 %v1216_v38 }
  0xeb   : > { %v2417_v6 = vadd.f32 %v688_v16, %v589_v1 }
  0xf0   : > { %v590_v35 = vpop.f32.mrf.mxu3  ;;  %v2419_v8 = vpop.f32.mrf.mxu2 }
  0xf1   : > { %v591_v9 = vadd.f32 %v590_v35, %v2332_v52  ;;  %v651_v10 = vpop.f32.mrf.mxu0  ;;  %v693_v14 = vpop.f32.mrf.mxu1 }
  0xf2   : > { %v665_v12 = vadd.f32 %v651_v10, %v2357_v5 }
  0xf3   : > { %v2427_v57 = vadd.f32 %v690_v7, %v591_v9  ;;  %1806 = vmatmul.msk.bf16.gmra.mxu0 %vm447_vm1, %v2195_v27 }
  0xf4   : > { %1811 = vmatmul.msk.bf16.gmra.mxu1 %vm447_vm1, %v2195_v27 }
  0xf5   : > { %1800 = vmatmul.msk.bf16.gmra.mxu3 %vm447_vm1, %v2339_v58  ;;  %1817 = vmatmul.msk.bf16.gmra.mxu2 %vm447_vm1, %v2192_v25 }
  0xf8   : > { %v593_v52 = vpop.f32.mrf.mxu3  ;;  %v767_v5 = vpop.f32.mrf.mxu2 }
  0xf9   : > { %v594_v20 = vadd.f32 %v593_v52, %v2352_v2  ;;  %v2441_v23 = vadd.f32 %v767_v5, %v665_v12  ;;  %v653_v26 = vpop.f32.mrf.mxu0  ;;  %v695_v27 = vpop.f32.mrf.mxu1  ;;  %v2455_v2 = vpack.c.bf16 %v1813_v34, %v2219_v40 }
  0xfa   : > { %v2445_v58 = vadd.f32 %v653_v26, %v2366_v21 }
  0xfb   : > { %v2447_v32 = vadd.f32 %v693_v14, %v594_v20 }
 0x100   : > { %v595_v43 = vpop.f32.mrf.mxu3  ;;  %v2452_v18 = vpop.f32.mrf.mxu2 }
 0x101   : > { %v596_v44 = vadd.f32 %v595_v43, %v2364_v17  ;;  %v656_v45 = vpop.f32.mrf.mxu0  ;;  %v698_v49 = vpop.f32.mrf.mxu1  ;;  %v782_v34 = vadd.f32 %v2452_v18, %v2445_v58 }
 0x102   : > { %v667_v21 = vadd.f32 %v656_v45, %v2378_v31 }
 0x103   : > { %v2459_v46 = vadd.f32 %v695_v27, %v596_v44  ;;  %1807 = vmatmul.msk.bf16.gmra.mxu0 %vm447_vm1, %v1056_v39 }
 0x104   : > { %1812 = vmatmul.msk.bf16.gmra.mxu1 %vm447_vm1, %v1056_v39 }
 0x105   : > { %1801 = vmatmul.msk.bf16.gmra.mxu3 %vm447_vm1, %v2368_v24  ;;  %1818 = vmatmul.msk.bf16.gmra.mxu2 %vm447_vm1, %v2455_v2 }
 0x108   : > { %v598_v40 = vpop.f32.mrf.mxu3  ;;  %v772_v41 = vpop.f32.mrf.mxu2 }
 0x109   : > { %v599_v17 = vadd.f32 %v598_v40, %v2376_v30  ;;  %v2468_v53 = vadd.f32 %v772_v41, %v667_v21  ;;  %v658_v31 = vpop.f32.mrf.mxu0  ;;  %v700_v59 = vpop.f32.mrf.mxu1  ;;  %v1824_v40 = vld [vmem:[%s2163_s29 + $0x201] sm:$0xff]  ;;  %s1592_s29 = sshll.u32 %s2661_s25, 4  ;;  %s1593_s29 = int_to_ptr.vmem [resolvable:$true] %s1592_s29 }
 0x10a   : > { %v2471_v54 = vadd.f32 %v658_v31, %v2382_v37  ;;  %v778_v37 = vadd.f32 %v2398_v55, %v2394_v50 }
 0x10b   : > { %v2473_v28 = vadd.f32 %v698_v49, %v599_v17 }
 0x110   : > { %v600_v60 = vpop.f32.mrf.mxu3  ;;  %v2475_v24 = vpop.f32.mrf.mxu2 }
 0x111   : > { %v601_v16 = vadd.f32 %v600_v60, %v2380_v36  ;;  %v873_v62 = vpop.f32.mrf.mxu0  ;;  %v915_v30 = vpop.f32.mrf.mxu1 }
 0x112   : > { %v893_v0 = vadd.f32 %v873_v62, %v2392_v47 }
 0x113   : > { %v2479_v1 = vadd.f32 %v700_v59, %v601_v16  ;;  %1826 = vmatmul.msk.bf16.vlgmr.msra.gmra.mxu0 %vm447_vm1, %v2235_v48  ;;  %v1883_v59 = vld [vmem:[%s2827_s2 + $0x38] sm:$0xff] }
 0x114   : > { %1831 = vmatmul.msk.bf16.vlgmr.msra.gmra.mxu1 %vm447_vm1, %v2235_v48  ;;  %1456 = vmatpush.bf16.msra.mxu2 %v1883_v59 }
 0x115   : > { %1820 = vmatmul.msk.bf16.vlgmr.msra.gmra.mxu3 %vm447_vm1, %v2169_v11 }
 0x118   : > { %v799_v3 = vpop.f32.mrf.mxu3  ;;  %v981_v36 = vpop.f32.mrf.mxu2 }
 0x119   : > { %v819_v7 = vadd.f32 %v799_v3, %v2396_v51  ;;  %v2490_v47 = vadd.f32 %v981_v36, %v893_v0  ;;  %v875_v35 = vpop.f32.mrf.mxu0  ;;  %v917_v10 = vpop.f32.mrf.mxu1  ;;  %v780_v51 = vadd.f32 %v2419_v8, %v2415_v4 }
 0x11a   : > { %v2492_v22 = vadd.f32 %v875_v35, %v778_v37  ;;  %v1881_v35 = vld [vmem:[%s2827_s2 + $0x28] sm:$0xff] }
 0x11b   : > { %v2494_v9 = vadd.f32 %v915_v30, %v819_v7 }
 0x120   : > { %v801_v38 = vpop.f32.mrf.mxu3  ;;  %v2496_v11 = vpop.f32.mrf.mxu2 }
 0x121   : > { %v820_v48 = vadd.f32 %v801_v38, %v2401_v61  ;;  %v878_v12 = vpop.f32.mrf.mxu0  ;;  %v920_v14 = vpop.f32.mrf.mxu1 }
 0x122   : > { %v895_v50 = vadd.f32 %v878_v12, %v2412_v42  ;;  %v1880_v12 = vld [vmem:[%s2827_s2 + $0x20] sm:$0xff] }
 0x123   : > { %v2500_v55 = vadd.f32 %v917_v10, %v820_v48  ;;  %1827 = vmatmul.msk.bf16.gmra.mxu0 %vm447_vm1, %v2246_v56 }
 0x124   : > { %1832 = vmatmul.msk.bf16.gmra.mxu1 %vm447_vm1, %v2246_v56 }
 0x125   : > { %1821 = vmatmul.msk.bf16.gmra.mxu3 %vm447_vm1, %v2180_v19 }
 0x128   : > { %v804_v52 = vpop.f32.mrf.mxu3  ;;  %v986_v61 = vpop.f32.mrf.mxu2 }
 0x129   : > { %v821_v5 = vadd.f32 %v804_v52, %v2417_v6  ;;  %v2511_v42 = vadd.f32 %v986_v61, %v895_v50  ;;  %v880_v15 = vpop.f32.mrf.mxu0  ;;  %v922_v29 = vpop.f32.mrf.mxu1 }
 0x12a   : > { %v2513_v20 = vadd.f32 %v880_v15, %v780_v51  ;;  %v1879_v51 = vld [vmem:[%s2827_s2 + $0x18] sm:$0xff]  ;;  %v1878_v15 = vld [vmem:[%s2827_s2 + $0x10] sm:$0xff] }
 0x12b   : > { %v2515_v26 = vadd.f32 %v920_v14, %v821_v5 }
 0x130   : > { %v806_v27 = vpop.f32.mrf.mxu3  ;;  %v2517_v19 = vpop.f32.mrf.mxu2 }
 0x131   : > { %v822_v56 = vadd.f32 %v806_v27, %v2427_v57  ;;  %v883_v33 = vpop.f32.mrf.mxu0  ;;  %v925_v6 = vpop.f32.mrf.mxu1 }
 0x132   : > { %v897_v4 = vadd.f32 %v883_v33, %v2441_v23 }
 0x133   : > { %v2521_v8 = vadd.f32 %v922_v29, %v822_v56  ;;  %1828 = vmatmul.msk.bf16.gmra.mxu0 %vm447_vm1, %v2257_v63 }
 0x134   : > { %1833 = vmatmul.msk.bf16.gmra.mxu1 %vm447_vm1, %v2257_v63 }
 0x135   : > { %1822 = vmatmul.msk.bf16.gmra.mxu3 %vm447_vm1, %v2192_v25  ;;  %v1259_v25 = vpack.c.bf16 %v1824_v40, %v2286_v13  ;;  %v784_v13 = vadd.f32 %v2475_v24, %v2471_v54 }
 0x138   : > { %v809_v57 = vpop.f32.mrf.mxu3  ;;  %v991_v39 = vpop.f32.mrf.mxu2 }
 0x139   : > { %v823_v43 = vadd.f32 %v809_v57, %v2447_v32  ;;  %v1005_v23 = vadd.f32 %v991_v39, %v897_v4  ;;  %v885_v44 = vpop.f32.mrf.mxu0  ;;  %v927_v49 = vpop.f32.mrf.mxu1 }
 0x13a   : > { %v2532_v45 = vadd.f32 %v885_v44, %v782_v34 }
 0x13b   : > { %v2534_v21 = vadd.f32 %v925_v6, %v823_v43  ;;  %v1877_v6 = vld [vmem:[%s2827_s2 + $0x8] sm:$0xff] }
 0x140   : > { %v811_v41 = vpop.f32.mrf.mxu3  ;;  %v2538_v17 = vpop.f32.mrf.mxu2 }
 0x141   : > { %v824_v63 = vadd.f32 %v811_v41, %v2459_v46  ;;  %v888_v58 = vpop.f32.mrf.mxu0  ;;  %v930_v32 = vpop.f32.mrf.mxu1 }
 0x142   : > { %v899_v18 = vadd.f32 %v888_v58, %v2468_v53 }
 0x143   : > { %v2542_v31 = vadd.f32 %v927_v49, %v824_v63  ;;  %1829 = vmatmul.msk.bf16.gmra.mxu0 %vm447_vm1, %v1259_v25 }
 0x144   : > { %1834 = vmatmul.msk.bf16.gmra.mxu1 %vm447_vm1, %v1259_v25 }
 0x145   : > { %1823 = vmatmul.msk.bf16.gmra.mxu3 %vm447_vm1, %v2455_v2  ;;  %v1882_v2 = vld [vmem:[%s2827_s2 + $0x30] sm:$0xff] }
 0x146   : > { %1457 = vmatpush.bf16.msra.mxu2 %v1882_v2 }
 0x148   : > { %v814_v46 = vpop.f32.mrf.mxu3  ;;  %v996_v53 = vpop.f32.mrf.mxu2 }
 0x149   : > { %v825_v60 = vadd.f32 %v814_v46, %v2473_v28  ;;  %v1007_v16 = vadd.f32 %v996_v53, %v899_v18  ;;  %v890_v62 = vpop.f32.mrf.mxu0  ;;  %v932_v37 = vpop.f32.mrf.mxu1 }
 0x14a   : > { %v2554_v0 = vadd.f32 %v890_v62, %v784_v13  ;;  %1458 = vmatpush.bf16.msra.mxu2 %v1881_v35  ;;  %v2630_v62 = vld [vmem:[%s2828_s4] ss:$0 sm:$0xff] }
 0x14b   : > { %v2556_v30 = vadd.f32 %v930_v32, %v825_v60  ;;  %v1002_v60 = vadd.f32 %v2496_v11, %v2492_v22 }
 0x14e   : > { %1459 = vmatpush.bf16.msra.mxu2 %v1880_v12 }
 0x150   : > { %v816_v3 = vpop.f32.mrf.mxu3  ;;  %v2596_v33 = vpop.f32.mrf.mxu2 }
 0x151   : > { %v826_v36 = vadd.f32 %v816_v3, %v2479_v1  ;;  %v1083_v54 = vpop.f32.mrf.mxu0  ;;  %v1125_v28 = vpop.f32.mrf.mxu1 }
 0x152   : > { %v1103_v24 = vadd.f32 %v1083_v54, %v2490_v47  ;;  %1460 = vmatpush.bf16.msra.mxu2 %v1879_v51 }
 0x153   : > { %v2563_v7 = vadd.f32 %v932_v37, %v826_v36 }
 0x156   : > { %1461 = vmatpush.bf16.msra.mxu2 %v1878_v15 }
 0x158   : > { %v1023_v10 = vpop.f32.mrf.mxu3  ;;  %v1185_v39 = vpop.f32.mrf.mxu2 }
 0x159   : > { %v1085_v38 = vpop.f32.mrf.mxu0  ;;  %v2568_v48 = vpop.f32.mrf.mxu1  ;;  %v1205_v59 = vadd.f32 %v1185_v39, %v1103_v24  ;;  %v1043_v13 = vadd.f32 %v1023_v10, %v2494_v9  ;;  %v2636_v9 = vld [vmem:[%s2829_s5] ss:$0 sm:$0xff] }
 0x15a   : > { %1462 = vmatpush.bf16.msra.mxu2 %v1877_v6  ;;  %v1104_v37 = vadd.f32 %v1085_v38, %v1002_v60  ;;  %v2644_v24 = vld [vmem:[%s2811_s8] ss:$0 sm:$0xff] }
 0x15b   : > { %v1145_v2 = vadd.f32 %v1125_v28, %v1043_v13  ;;  %v2651_v38 = vld [vmem:[%s2812_s9] ss:$0 sm:$0xff] }
 0x160   : > { %v1025_v1 = vpop.f32.mrf.mxu3  ;;  %v1187_v41 = vpop.f32.mrf.mxu2 }
 0x161   : > { %v1088_v50 = vpop.f32.mrf.mxu0  ;;  %v2576_v14 = vpop.f32.mrf.mxu1  ;;  %v1206_v3 = vadd.f32 %v1187_v41, %v1104_v37  ;;  %v1044_v35 = vadd.f32 %v1025_v1, %v2500_v55 }
 0x162   : > { %v2574_v47 = vadd.f32 %v1088_v50, %v2511_v42 }
 0x163   : > { %v1146_v39 = vadd.f32 %v2568_v48, %v1044_v35 }
 0x168   : > { %v2581_v52 = vpop.f32.mrf.mxu3  ;;  %v1190_v46 = vpop.f32.mrf.mxu2 }
 0x169   : > { %v2583_v61 = vpop.f32.mrf.mxu0  ;;  %v2585_v5 = vpop.f32.mrf.mxu1 }
 0x170   : > { %v2590_v42 = vpop.f32.mrf.mxu3  ;;  %v1192_v15 = vpop.f32.mrf.mxu2 }
 0x171   : > { %v1093_v29 = vpop.f32.mrf.mxu0  ;;  %v2594_v56 = vpop.f32.mrf.mxu1 }
 0x172   : > { %v2592_v27 = vadd.f32 %v1093_v29, %v1005_v23  ;;  %v1876_v23 = vld [vmem:[%s2827_s2] sm:$0xff] }
 0x173   : > { %1463 = vmatpush.bf16.msra.mxu2 %v1876_v23 }
 0x178   : > { %v2598_v4 = vpop.f32.mrf.mxu3 }
 0x179   : > { %v2603_v34 = vpop.f32.mrf.mxu0  ;;  %v2605_v57 = vpop.f32.mrf.mxu1 }
 0x180   : > { %v2607_v43 = vpop.f32.mrf.mxu3 }
 0x181   : > { %v1098_v44 = vpop.f32.mrf.mxu0  ;;  %v2614_v40 = vpop.f32.mrf.mxu1 }
 0x182   : > { %v2612_v49 = vadd.f32 %v1098_v44, %v1007_v16 }
 0x188   : > { %v2616_v25 = vpop.f32.mrf.mxu3 }
 0x189   : > { %v2618_v63 = vpop.f32.mrf.mxu0  ;;  %v2620_v58 = vpop.f32.mrf.mxu1 }
 0x190   : > { %v2622_v18 = vpop.f32.mrf.mxu3 }
 0x191   : > { %v1286_v32 = vpop.f32.mrf.mxu0  ;;  %v1328_v53 = vpop.f32.mrf.mxu1 }
 0x192   : > { %v1306_v16 = vadd.f32 %v1286_v32, %v1205_v59  ;;  %v1207_v59 = vadd.f32 %v1190_v46, %v2574_v47 }
 0x194   : > { %v1360_v36 = vmul.f32 %v2630_v62, %v1306_v16  ;;  %v1004_v16 = vadd.f32 %v2517_v19, %v2513_v20  ;;  %v1046_v19 = vadd.f32 %v2590_v42, %v2521_v8 }
 0x196   : > { %v1372_v50 = vadd.f32 %v2636_v9, %v1360_v36 }
 0x198   : > { %v1227_v54 = vpop.f32.mrf.mxu3  ;;  %v1380_v1 = vmax.f32 %v1372_v50, 0.0  ;;  %v1148_v50 = vadd.f32 %v2585_v5, %v1046_v19  ;;  %v1006_v5 = vadd.f32 %v2538_v17, %v2532_v45  ;;  %v1048_v45 = vadd.f32 %v2607_v43, %v2542_v31 }
 0x199   : > { %v1247_v22 = vadd.f32 %v1227_v54, %v1145_v2  ;;  %v1288_v11 = vpop.f32.mrf.mxu0  ;;  %v1330_v12 = vpop.f32.mrf.mxu1  ;;  %v1049_v19 = vadd.f32 %v2616_v25, %v2556_v30 }
 0x19a   : > { %v1307_v28 = vadd.f32 %v1288_v11, %v1206_v3  ;;  %v1106_v3 = vadd.f32 %v2583_v61, %v1004_v16  ;;  %v1195_v54 = vpop.f32.mrf.mxu2 }
 0x19b   : > { %v1348_v10 = vadd.f32 %v1328_v53, %v1247_v22  ;;  %v1045_v53 = vadd.f32 %v2581_v52, %v2515_v26 }
 0x19c   : > { %v1361_v51 = vmul.f32 %v2630_v62, %v1307_v28  ;;  %v1208_v46 = vadd.f32 %v1192_v15, %v1106_v3 }
 0x19d   : > { %v1529_v29 = vmul.f32 %v2644_v24, %v1348_v10  ;;  %v1147_v36 = vadd.f32 %v2576_v14, %v1045_v53 }
 0x19e   : > { %v1373_v6 = vadd.f32 %v2636_v9, %v1361_v51 }
 0x19f   : > { %v1541_v55 = vadd.f32 %v2651_v38, %v1529_v29 }
 0x1a0   : > { %v1381_v23 = vmax.f32 %v1373_v6, 0.0  ;;  %v1229_v44 = vpop.f32.mrf.mxu3 }
 0x1a1   : > { %1549 = vst [vmem:[%s2661_s25] sm:$0xff] %v1541_v55  ;;  %v1248_v41 = vadd.f32 %v1229_v44, %v1146_v39  ;;  %v1291_v32 = vpop.f32.mrf.mxu0  ;;  %v1333_v60 = vpop.f32.mrf.mxu1  ;;  %v1209_v55 = vadd.f32 %v1195_v54, %v2592_v27 }
 0x1a2   : > { %v1388_v13 = vpack.c.bf16 %v1381_v23, %v1380_v1  ;;  %v1308_v37 = vadd.f32 %v1291_v32, %v1207_v59  ;;  %v1197_v39 = vpop.f32.mrf.mxu2  ;;  %v1047_v23 = vadd.f32 %v2598_v4, %v2534_v21 }
 0x1a3   : > { %v1349_v48 = vadd.f32 %v1330_v12, %v1248_v41 }
 0x1a4   : > { %1464 = vmatmul.bf16.vlgmr.msra.gmra.mxu2 %v1388_v13  ;;  %v1362_v22 = vmul.f32 %v2630_v62, %v1308_v37  ;;  %v1108_v13 = vadd.f32 %v2603_v34, %v1006_v5  ;;  %v1149_v53 = vadd.f32 %v2594_v56, %v1047_v23 }
 0x1a5   : > { %v1530_v2 = vmul.f32 %v2644_v24, %v1349_v48 }
 0x1a6   : > { %v1374_v61 = vadd.f32 %v2636_v9, %v1362_v22  ;;  %v1210_v27 = vadd.f32 %v1197_v39, %v1108_v13 }
 0x1a7   : > { %v1542_v47 = vadd.f32 %v2651_v38, %v1530_v2 }
 0x1a8   : > { %v1232_v26 = vpop.f32.mrf.mxu3  ;;  %v1382_v15 = vmax.f32 %v1374_v61, 0.0 }
 0x1a9   : > { %1550 = vst [vmem:[%s2661_s25 + $0x8] sm:$0xff] %v1542_v47  ;;  %v1249_v52 = vadd.f32 %v1232_v26, %v1147_v36  ;;  %v1293_v11 = vpop.f32.mrf.mxu0  ;;  %v1335_v35 = vpop.f32.mrf.mxu1  ;;  %v1150_v47 = vadd.f32 %v2605_v57, %v1048_v45 }
 0x1aa   : > { %v1309_v20 = vadd.f32 %v1293_v11, %v1208_v46  ;;  %v1200_v17 = vpop.f32.mrf.mxu2 }
 0x1ab   : > { %v1350_v28 = vadd.f32 %v1333_v60, %v1249_v52  ;;  %v1211_v11 = vadd.f32 %v1200_v17, %v2612_v49 }
 0x1ac   : > { %v1363_v14 = vmul.f32 %v2630_v62, %v1309_v20 }
 0x1ad   : > { %v1531_v10 = vmul.f32 %v2644_v24, %v1350_v28 }
 0x1ae   : > { %v1375_v12 = vadd.f32 %v2636_v9, %v1363_v14 }
 0x1af   : > { %v1543_v51 = vadd.f32 %v2651_v38, %v1531_v10 }
 0x1b0   : > { %v1383_v29 = vmax.f32 %v1375_v12, 0.0  ;;  %v1234_v6 = vpop.f32.mrf.mxu3 }
 0x1b1   : > { %1551 = vst [vmem:[%s2661_s25 + $0x10] sm:$0xff] %v1543_v51  ;;  %v1250_v8 = vadd.f32 %v1234_v6, %v1148_v50  ;;  %v1296_v42 = vpop.f32.mrf.mxu0  ;;  %v1338_v41 = vpop.f32.mrf.mxu1  ;;  %v1151_v50 = vadd.f32 %v2614_v40, %v1049_v19 }
 0x1b2   : > { %v1389_v1 = vpack.c.bf16 %v1383_v29, %v1382_v15  ;;  %v1310_v32 = vadd.f32 %v1296_v42, %v1209_v55  ;;  %v1202_v61 = vpop.f32.mrf.mxu2  ;;  %v1050_v29 = vadd.f32 %v2622_v18, %v2563_v7 }
 0x1b3   : > { %v1351_v44 = vadd.f32 %v1335_v35, %v1250_v8  ;;  %v1008_v35 = vadd.f32 %v2596_v33, %v2554_v0 }
 0x1b4   : > { %1469 = vmatmul.bf16.gmra.mxu2 %v1389_v1  ;;  %v1364_v60 = vmul.f32 %v2630_v62, %v1310_v32  ;;  %v1152_v42 = vadd.f32 %v2620_v58, %v1050_v29 }
 0x1b5   : > { %v1532_v59 = vmul.f32 %v2644_v24, %v1351_v44  ;;  %v1110_v10 = vadd.f32 %v2618_v63, %v1008_v35 }
 0x1b6   : > { %v1376_v34 = vadd.f32 %v2636_v9, %v1364_v60 }
 0x1b7   : > { %v1544_v48 = vadd.f32 %v2651_v38, %v1532_v59  ;;  %v1212_v51 = vadd.f32 %v1202_v61, %v1110_v10 }
 0x1b8   : > { %v1237_v16 = vpop.f32.mrf.mxu3  ;;  %v1384_v22 = vmax.f32 %v1376_v34, 0.0 }
 0x1b9   : > { %1552 = vst [vmem:[%s2661_s25 + $0x18] sm:$0xff] %v1544_v48  ;;  %v1251_v21 = vadd.f32 %v1237_v16, %v1149_v53  ;;  %v1298_v4 = vpop.f32.mrf.mxu0  ;;  %v1340_v3 = vpop.f32.mrf.mxu1 }
 0x1ba   : > { %v1311_v37 = vadd.f32 %v1298_v4, %v1210_v27 }
 0x1bb   : > { %v1352_v2 = vadd.f32 %v1338_v41, %v1251_v21 }
 0x1bc   : > { %v1365_v56 = vmul.f32 %v2630_v62, %v1311_v37 }
 0x1bd   : > { %v1533_v36 = vmul.f32 %v2644_v24, %v1352_v2 }
 0x1be   : > { %v1377_v54 = vadd.f32 %v2636_v9, %v1365_v56 }
 0x1bf   : > { %v1545_v46 = vadd.f32 %v2651_v38, %v1533_v36 }
 0x1c0   : > { %v1385_v26 = vmax.f32 %v1377_v54, 0.0  ;;  %v1239_v52 = vpop.f32.mrf.mxu3 }
 0x1c1   : > { %1553 = vst [vmem:[%s2661_s25 + $0x20] sm:$0xff] %v1545_v46  ;;  %v1252_v31 = vadd.f32 %v1239_v52, %v1150_v47  ;;  %v1301_v43 = vpop.f32.mrf.mxu0  ;;  %v1343_v12 = vpop.f32.mrf.mxu1 }
 0x1c2   : > { %v1390_v20 = vpack.c.bf16 %v1385_v26, %v1384_v22  ;;  %v1312_v57 = vadd.f32 %v1301_v43, %v1211_v11 }
 0x1c3   : > { %v1353_v28 = vadd.f32 %v1340_v3, %v1252_v31 }
 0x1c4   : > { %1474 = vmatmul.bf16.gmra.mxu2 %v1390_v20  ;;  %v1366_v15 = vmul.f32 %v2630_v62, %v1312_v57 }
 0x1c5   : > { %v1534_v14 = vmul.f32 %v2644_v24, %v1353_v28 }
 0x1c6   : > { %v1378_v63 = vadd.f32 %v2636_v9, %v1366_v15 }
 0x1c7   : > { %v1546_v49 = vadd.f32 %v2651_v38, %v1534_v14 }
 0x1c8   : > { %v1242_v30 = vpop.f32.mrf.mxu3  ;;  %v1386_v1 = vmax.f32 %v1378_v63, 0.0 }
 0x1c9   : > { %1554 = vst [vmem:[%s2661_s25 + $0x28] sm:$0xff] %v1546_v49  ;;  %v1253_v25 = vadd.f32 %v1242_v30, %v1151_v50  ;;  %v1303_v0 = vpop.f32.mrf.mxu0  ;;  %v1345_v18 = vpop.f32.mrf.mxu1 }
 0x1ca   : > { %v1313_v33 = vadd.f32 %v1303_v0, %v1212_v51 }
 0x1cb   : > { %v1354_v6 = vadd.f32 %v1343_v12, %v1253_v25 }
 0x1cc   : > { %v1367_v39 = vmul.f32 %v2630_v62, %v1313_v33 }
 0x1cd   : > { %v1535_v40 = vmul.f32 %v2644_v24, %v1354_v6 }
 0x1ce   : > { %v1379_v8 = vadd.f32 %v2636_v9, %v1367_v39 }
 0x1cf   : > { %v1547_v55 = vadd.f32 %v2651_v38, %v1535_v40 }
 0x1d0   : > { %v1387_v23 = vmax.f32 %v1379_v8, 0.0  ;;  %v1244_v7 = vpop.f32.mrf.mxu3 }
 0x1d1   : > { %1555 = vst [vmem:[%s2661_s25 + $0x30] sm:$0xff] %v1547_v55  ;;  %v1254_v44 = vadd.f32 %v1244_v7, %v1152_v42 }
 0x1d2   : > { %v1391_v62 = vpack.c.bf16 %v1387_v23, %v1386_v1 }
 0x1d3   : > { %v1355_v41 = vadd.f32 %v1345_v18, %v1254_v44 }
 0x1d4   : > { %1479 = vmatmul.bf16.gmra.mxu2 %v1391_v62 }
 0x1d5   : > { %v1536_v5 = vmul.f32 %v2644_v24, %v1355_v41 }
 0x1d7   : > { %v1548_v9 = vadd.f32 %v2651_v38, %v1536_v5 }
 0x1d9   : > { %1556 = vst [vmem:[%s2661_s25 + $0x38] sm:$0xff] %v1548_v9 }
 0x1da   : > { %1968 = shalt.err (!%p1965_p3)
}
 0x1db   : > { %s2037_s25 = smov 128   ;;  %s2038_s12 = smov 8   ;;  %v1939_v58 = vld [vmem:[%s2809_s6] ss:$0 sm:$0xff] }
 0x1dc   : > { %1890 = dma.vmem_to_hbm [thread:$0]  (%p2137_p5), %s1593_s29, 1024, %s1595_s22, %s1563_s24, %s2037_s25, %s2037_s25, %s2038_s12  }
 0x1dd   : > { %v1940_v24 = vld [vmem:[%s2810_s7] ss:$0 sm:$0xff]  ;;  %s2830_s0 = sshll.u32 %s2639_s14, 6  ;;  %s1574_s15 = scalar_lea.hbm %s2813_s10, %s1884_s30 }
 0x1de   : > { %s2756_s3 = scalar_lea.vmem [#allocation2], %s2830_s0  ;;  %s1577_s22 = sshll.u32 %s1574_s15, 4  ;;  %s1578_s22 = int_to_ptr.hbm [resolvable:$true] %s1577_s22 }
 0x1df   : > { %s1575_s29 = sshll.u32 %s2756_s3, 4  ;;  %s1558_s24 = scalar_lea.sflag [#allocation3], %s2639_s14  ;;  %s1576_s29 = int_to_ptr.vmem [resolvable:$true] %s1575_s29 }
 0x1e0   : > { %s1983_s13 = sshra.s32 %s1578_s22, 4  ;;  %s1989_s30 = scalar_lea.hbm %s2813_s10, 128  ;;  %s1984_s13 = int_to_ptr.hbm [resolvable:$true] %s1983_s13 }
 0x1e1   : > { %s1985_s1 = scalar_lea.hbm %s1984_s13, 64  ;;  %p1990_p9 = scmp.lt.s32.totalorder %s1984_s13, %s2813_s10 }
 0x1e2   : > { %p1986_p4 = scmp.ne.s32.totalorder %s1984_s13, %s1985_s1  ;;  %p1991_p10 = scmp.lt.s32.totalorder %s1989_s30, %s1985_s1 }
 0x1e4   : > { %p1987_p7 = pnand %p1986_p4, %p2137_p5  ;;  %p1992_p11 = por %p1991_p10, %p1990_p9 }
 0x1e6   : > { %p1988_p8 = pneg %p1987_p7 }
 0x1e8   : > { %p1993_p12 = pnand %p1992_p11, %p1988_p8 }
 0x227   : > { %v1465_v38 = vpop.f32.mrf.mxu2 }
 0x228   : > { %v1489_v32 = vmul.f32 %v1939_v58, %v1465_v38 }
 0x22a   : > { %v1501_v59 = vadd.f32 %v1940_v24, %v1489_v32 }
 0x22c   : > { %v1509_v13 = vmax.f32 %v1501_v59, 0.0 }
 0x22e   : > { %1517 = vst [vmem:[%s2756_s3] sm:$0xff] %v1509_v13 }
 0x22f   : > { %v1467_v53 = vpop.f32.mrf.mxu2 }
 0x230   : > { %v1490_v48 = vmul.f32 %v1939_v58, %v1467_v53 }
 0x232   : > { %v1502_v27 = vadd.f32 %v1940_v24, %v1490_v48 }
 0x234   : > { %v1510_v60 = vmax.f32 %v1502_v27, 0.0 }
 0x236   : > { %1518 = vst [vmem:[%s2756_s3 + $0x8] sm:$0xff] %v1510_v60 }
 0x237   : > { %v1470_v16 = vpop.f32.mrf.mxu2 }
 0x238   : > { %v1491_v21 = vmul.f32 %v1939_v58, %v1470_v16 }
 0x23a   : > { %v1503_v4 = vadd.f32 %v1940_v24, %v1491_v21 }
 0x23c   : > { %v1511_v37 = vmax.f32 %v1503_v4, 0.0 }
 0x23e   : > { %1519 = vst [vmem:[%s2756_s3 + $0x10] sm:$0xff] %v1511_v37 }
 0x23f   : > { %v1472_v45 = vpop.f32.mrf.mxu2 }
 0x240   : > { %v1492_v17 = vmul.f32 %v1939_v58, %v1472_v45 }
 0x242   : > { %v1504_v2 = vadd.f32 %v1940_v24, %v1492_v17 }
 0x244   : > { %v1512_v34 = vmax.f32 %v1504_v2, 0.0 }
 0x246   : > { %1520 = vst [vmem:[%s2756_s3 + $0x18] sm:$0xff] %v1512_v34 }
 0x247   : > { %v1475_v56 = vpop.f32.mrf.mxu2 }
 0x248   : > { %v1493_v3 = vmul.f32 %v1939_v58, %v1475_v56 }
 0x24a   : > { %v1505_v36 = vadd.f32 %v1940_v24, %v1493_v3 }
 0x24c   : > { %v1513_v54 = vmax.f32 %v1505_v36, 0.0 }
 0x24e   : > { %1521 = vst [vmem:[%s2756_s3 + $0x20] sm:$0xff] %v1513_v54 }
 0x24f   : > { %v1477_v47 = vpop.f32.mrf.mxu2 }
 0x250   : > { %v1494_v46 = vmul.f32 %v1939_v58, %v1477_v47 }
 0x252   : > { %v1506_v22 = vadd.f32 %v1940_v24, %v1494_v46 }
 0x254   : > { %v1514_v26 = vmax.f32 %v1506_v22, 0.0 }
 0x256   : > { %1522 = vst [vmem:[%s2756_s3 + $0x28] sm:$0xff] %v1514_v26 }
 0x257   : > { %v1480_v52 = vpop.f32.mrf.mxu2 }
 0x258   : > { %v1495_v31 = vmul.f32 %v1939_v58, %v1480_v52 }
 0x25a   : > { %v1507_v43 = vadd.f32 %v1940_v24, %v1495_v31 }
 0x25c   : > { %v1515_v11 = vmax.f32 %v1507_v43, 0.0 }
 0x25e   : > { %1523 = vst [vmem:[%s2756_s3 + $0x30] sm:$0xff] %v1515_v11 }
 0x25f   : > { %v1482_v20 = vpop.f32.mrf.mxu2 }
 0x260   : > { %v1496_v19 = vmul.f32 %v1939_v58, %v1482_v20 }
 0x262   : > { %v1508_v28 = vadd.f32 %v1940_v24, %v1496_v19 }
 0x264   : > { %v1516_v35 = vmax.f32 %v1508_v28, 0.0 }
 0x266   : > { %1524 = vst [vmem:[%s2756_s3 + $0x38] sm:$0xff] %v1516_v35 }
 0x267   : > { %1996 = shalt.err (!%p1993_p12)
}
 0x268   : > { %1889 = dma.vmem_to_hbm [thread:$0]  (%p2137_p5), %s1576_s29, 1024, %s1578_s22, %s1558_s24, %s2037_s25, %s2037_s25, %s2038_s12  }
 0x269 PF: > { %p1900_p13 = scmp.ge.s32.totalorder %s2035_s20, 2  ;;  %s1609_s14 = sand.u32 1, %s2023_s17  }
 0x26a   : > { %s1610_s3 = scalar_lea.sflag [#allocation3], %s1609_s14 }
 0x26b   : > { %p1894_p0 = pnand %p1900_p13, %p2141_p6 }
 0x26d   : > { %p1895_p1 = pneg %p1894_p0 }
 0x26f   : > { %2014 = dma.done.wait (%p1895_p1), %s1610_s3, 1024  }
 0x270   : > { %2016 = vsyncadd (%p1895_p1), %s1610_s3, 4294966272  ;;  %s1620_s5 = scalar_lea.sflag [#allocation5], %s1609_s14 }
 0x271   : > { %2018 = dma.done.wait (%p1895_p1), %s1620_s5, 1024  }
 0x272   : > { %2020 = vsyncadd (%p1895_p1), %s1620_s5, 4294966272  ;;  %p25_p5 = scmp.ge.s32.totalorder %s2124_s23, 4   ;;  %s2831_s17 = smov %s2027_s18 }
 0x273   : > { %s2832_s18 = smov %s2031_s19  ;;  %s2833_s19 = smov %s2135_s26 }
 0x274   : > { %s2834_s20 = smov %s2124_s23  ;;  %27 = sbr.rel (!%p25_p5) target bundleno = 12 (0xc), region = 161 }
 0x279   :  { %1626 = vsyncpa [#allocation3], 1 }
 0x27a   :  { %1628 = vsyncpa [#allocation3 + $0x1], 1 }
 0x27b   :  { %1629 = vsyncpa [#allocation5], 1 }
 0x27c   :  { %1631 = vsyncpa [#allocation5 + $0x1], 1 }

</bundles_post_ra>
